<compile_context>
chip_gen: v5e
topology: v5e:2x2
jax: 0.10.0
libtpu: 0.0.40
codegen_flags: <defaults>
</compile_context>

<pallas_src>
import jax
import jax.numpy as jnp
from jax.experimental import pallas as pl
from jax.experimental.pallas import tpu as pltpu

_LANES = 128  # vreg lane width

# Per-block byte budget for the tiled (large-activation) path.
# 2 inputs x 2 buffers + 1 output x 2 buffers = 6 live blocks -> 12 MiB at
# 2 MiB/block, which fits the v5e 16 MiB scoped-VMEM default (and is far under
# v6e/v7x's 32 MiB) while amortizing the ~0.35 us per-grid-step cost to a few
# percent of HBM time on every generation.
_BLOCK_BYTES = 2 * 1024 * 1024

# Anything at or below this per-input size goes through the single-block path.
_SINGLE_BLOCK_BYTES = 1 * 1024 * 1024


def _add_kernel(a_ref, b_ref, o_ref):
    o_ref[...] = a_ref[...] + b_ref[...]


def _sublanes_for(dtype):
    # Minimum sublane granularity: 8 (4-byte), 16 (2-byte), 32 (1-byte) dtypes.
    itemsize = jnp.dtype(dtype).itemsize
    return max(8, 32 // max(itemsize, 1))


def pallas_add(x427, x413):
    """x428 = x427 + x413 (elementwise residual add)."""
    assert x427.shape == x413.shape, "broadcasting not needed for this module"
    assert x427.dtype == x413.dtype
    shape, dtype = x427.shape, x427.dtype
    n = x427.size
    itemsize = jnp.dtype(dtype).itemsize
    nbytes = n * itemsize
    vmem = pltpu.MemorySpace.VMEM

    # ---- Small path (covers the module's 1x272x7x7 case) -------------------
    # Single full-array block, no grid, zero wrapper-side HBM traffic.
    if nbytes <= _SINGLE_BLOCK_BYTES:
        return pl.pallas_call(
            _add_kernel,
            out_shape=jax.ShapeDtypeStruct(shape, dtype),
            in_specs=[pl.BlockSpec(memory_space=vmem),
                      pl.BlockSpec(memory_space=vmem)],
            out_specs=pl.BlockSpec(memory_space=vmem),
        )(x427, x413)

    # ---- Large path: lane-dense (rows, 128) tiling --------------------------
    sub = _sublanes_for(dtype)
    flat_a = x427.reshape(-1)
    flat_b = x413.reshape(-1)

    if n % _LANES == 0:
        # Free (metadata-only) reshape; no padding, no output slice.
        padded_rows = n // _LANES
        a2 = flat_a.reshape(padded_rows, _LANES)
        b2 = flat_b.reshape(padded_rows, _LANES)
        needs_slice = False
    else:
        # TODO(synk): rare large-and-ragged fallback still pads/slices on the
        # host; handle the tail with an in-kernel masked store if this ever
        # becomes a hot path.
        rows = pl.cdiv(n, _LANES)
        padded_rows = ((rows + sub - 1) // sub) * sub
        pad = padded_rows * _LANES - n
        a2 = jnp.pad(flat_a, (0, pad)).reshape(padded_rows, _LANES)
        b2 = jnp.pad(flat_b, (0, pad)).reshape(padded_rows, _LANES)
        needs_slice = True

    # Block size: ~_BLOCK_BYTES per block, rows a multiple of the sublane
    # granularity, never larger than the array (partial last grid block is
    # masked by Pallas -- rows are NOT rounded up to a tile multiple).
    max_rows = max(sub, (_BLOCK_BYTES // (_LANES * itemsize)) // sub * sub)
    tile_rows = min(max_rows, (padded_rows // sub) * sub)
    tile_rows = max(tile_rows, sub)
    grid = (pl.cdiv(padded_rows, tile_rows),)

    blk = pl.BlockSpec((tile_rows, _LANES), lambda i: (i, 0), memory_space=vmem)

    out2 = pl.pallas_call(
        _add_kernel,
        out_shape=jax.ShapeDtypeStruct((padded_rows, _LANES), dtype),
        grid=grid,
        in_specs=[blk, blk],
        out_specs=blk,
        compiler_params=pltpu.CompilerParams(
            dimension_semantics=("parallel",),
        ),
    )(a2, b2)

    out_flat = out2.reshape(-1)
    if needs_slice:
        out_flat = out_flat[:n]
    return out_flat.reshape(shape)


if __name__ == "__main__":
    key = jax.random.PRNGKey(0)
    k1, k2 = jax.random.split(key)
    # Shapes from the module's forward: [1, 272, 7, 7] float32.
    x427 = jax.random.normal(k1, (1, 272, 7, 7), dtype=jnp.float32)
    x413 = jax.random.normal(k2, (1, 272, 7, 7), dtype=jnp.float32)

    out = jax.block_until_ready(pallas_add(x427, x413))

    ref = x427 + x413
    assert out.shape == (1, 272, 7, 7)
    assert out.dtype == x427.dtype
    assert jnp.allclose(out, ref, atol=1e-6, rtol=1e-6)
    print("KERNEL_OK")
</pallas_src>

<mosaic_0001>
module attributes {stable_mosaic.version = 11 : i64} {
  func.func @_add_kernel(%arg0: memref<1x272x7x7xf32, #tpu.memory_space<vmem>>, %arg1: memref<1x272x7x7xf32, #tpu.memory_space<vmem>>, %arg2: memref<1x272x7x7xf32, #tpu.memory_space<vmem>>) attributes {dimension_semantics = [], scalar_prefetch = 0 : i64, scratch_operands = 0 : i64, tpu.core_type = #tpu.core_type<tc>} {
    %c0 = arith.constant 0 : index
    %c0_0 = arith.constant 0 : index
    %c0_1 = arith.constant 0 : index
    %c0_2 = arith.constant 0 : index
    %0 = vector.load %arg0[%c0, %c0_0, %c0_1, %c0_2] : memref<1x272x7x7xf32, #tpu.memory_space<vmem>>, vector<1x272x7x7xf32>
    %c0_3 = arith.constant 0 : index
    %c0_4 = arith.constant 0 : index
    %c0_5 = arith.constant 0 : index
    %c0_6 = arith.constant 0 : index
    %1 = vector.load %arg1[%c0_3, %c0_4, %c0_5, %c0_6] : memref<1x272x7x7xf32, #tpu.memory_space<vmem>>, vector<1x272x7x7xf32>
    %2 = arith.addf %0, %1 : vector<1x272x7x7xf32>
    %c0_7 = arith.constant 0 : index
    %c0_8 = arith.constant 0 : index
    %c0_9 = arith.constant 0 : index
    %c0_10 = arith.constant 0 : index
    %3 = vector.load %arg2[%c0_7, %c0_8, %c0_9, %c0_10] : memref<1x272x7x7xf32, #tpu.memory_space<vmem>>, vector<1x272x7x7xf32>
    tpu.vector_store %arg2[%c0_7, %c0_8, %c0_9, %c0_10], %2 {strides = array<i32>} : memref<1x272x7x7xf32, #tpu.memory_space<vmem>>, vector<1x272x7x7xf32>,
    return
  }
}

</mosaic_0001>

<bundles_post_ra>
// kernel: tpu_custom_call.1
= control target key start
LH: loop header
LB: loop body
LE: loop exit
PB: predicated region body
PF: predicated region fallthrough
CT: control target
= control target key end

     0   :  { %vm827_vm0 = vcmask 55296   ;;  %s3839_s0 = inlined_call_operand.vmem [shape: f32[1,272,7,7], index: 0, kind: input, shape index: {}]   ;;  %s3840_s1 = inlined_call_operand.vmem [shape: f32[1,272,7,7], index: 1, kind: input, shape index: {}]   ;;  %s3841_s2 = inlined_call_operand.vmem [shape: f32[1,272,7,7], index: 2, kind: output, shape index: {}]  }
   0x1   :  { %v11_v0 = vld [vmem:[%s3839_s0] sm:$0x7f]  ;;  %v12_v2 = vld [vmem:[%s3839_s0 + $0x8] sm:$0x7f]  ;;  %v13_v5 = vld [vmem:[%s3839_s0 + $0x10] sm:$0x7f] }
   0x2   :  { %v283_v1 = vld [vmem:[%s3840_s1] sm:$0x7f]  ;;  %v284_v4 = vld [vmem:[%s3840_s1 + $0x8] sm:$0x7f]  ;;  %v285_v6 = vld [vmem:[%s3840_s1 + $0x10] sm:$0x7f] }
   0x3   :  { %v555_v3 = vadd.f32 %v283_v1, %v11_v0  ;;  %v556_v7 = vadd.f32 %v284_v4, %v12_v2  ;;  %v557_v8 = vadd.f32 %v285_v6, %v13_v5  ;;  %v14_v9 = vld [vmem:[%s3839_s0 + $0x18] sm:$0x7f]  ;;  %v15_v11 = vld [vmem:[%s3839_s0 + $0x20] sm:$0x7f]  ;;  %v16_v14 = vld [vmem:[%s3839_s0 + $0x28] sm:$0x7f] }
   0x4   :  { %v286_v10 = vld [vmem:[%s3840_s1 + $0x18] sm:$0x7f]  ;;  %v287_v13 = vld [vmem:[%s3840_s1 + $0x20] sm:$0x7f]  ;;  %v288_v16 = vld [vmem:[%s3840_s1 + $0x28] sm:$0x7f] }
   0x5   :  { %828 = vst.msk [vmem:[%s3841_s2] sm:$0x7f] %vm827_vm0, %v555_v3  ;;  %v558_v12 = vadd.f32 %v286_v10, %v14_v9  ;;  %v559_v15 = vadd.f32 %v287_v13, %v15_v11  ;;  %v17_v17 = vld [vmem:[%s3839_s0 + $0x30] sm:$0x7f]  ;;  %v560_v18 = vadd.f32 %v288_v16, %v16_v14  ;;  %v18_v20 = vld [vmem:[%s3839_s0 + $0x38] sm:$0x7f] }
   0x6   :  { %829 = vst.msk [vmem:[%s3841_s2 + $0x8] sm:$0x7f] %vm827_vm0, %v556_v7  ;;  %v289_v19 = vld [vmem:[%s3840_s1 + $0x30] sm:$0x7f]  ;;  %v290_v22 = vld [vmem:[%s3840_s1 + $0x38] sm:$0x7f] }
   0x7   :  { %830 = vst.msk [vmem:[%s3841_s2 + $0x10] sm:$0x7f] %vm827_vm0, %v557_v8  ;;  %v561_v21 = vadd.f32 %v289_v19, %v17_v17  ;;  %v19_v23 = vld [vmem:[%s3839_s0 + $0x40] sm:$0x7f]  ;;  %v562_v24 = vadd.f32 %v290_v22, %v18_v20  ;;  %v20_v26 = vld [vmem:[%s3839_s0 + $0x48] sm:$0x7f] }
   0x8   :  { %831 = vst.msk [vmem:[%s3841_s2 + $0x18] sm:$0x7f] %vm827_vm0, %v558_v12  ;;  %v291_v25 = vld [vmem:[%s3840_s1 + $0x40] sm:$0x7f]  ;;  %v292_v28 = vld [vmem:[%s3840_s1 + $0x48] sm:$0x7f] }
   0x9   :  { %832 = vst.msk [vmem:[%s3841_s2 + $0x20] sm:$0x7f] %vm827_vm0, %v559_v15  ;;  %v563_v27 = vadd.f32 %v291_v25, %v19_v23  ;;  %v21_v29 = vld [vmem:[%s3839_s0 + $0x50] sm:$0x7f]  ;;  %v564_v30 = vadd.f32 %v292_v28, %v20_v26  ;;  %v22_v32 = vld [vmem:[%s3839_s0 + $0x58] sm:$0x7f] }
   0xa   :  { %833 = vst.msk [vmem:[%s3841_s2 + $0x28] sm:$0x7f] %vm827_vm0, %v560_v18  ;;  %v293_v31 = vld [vmem:[%s3840_s1 + $0x50] sm:$0x7f]  ;;  %v294_v34 = vld [vmem:[%s3840_s1 + $0x58] sm:$0x7f] }
   0xb   :  { %834 = vst.msk [vmem:[%s3841_s2 + $0x30] sm:$0x7f] %vm827_vm0, %v561_v21  ;;  %v565_v33 = vadd.f32 %v293_v31, %v21_v29  ;;  %v23_v35 = vld [vmem:[%s3839_s0 + $0x60] sm:$0x7f]  ;;  %v566_v36 = vadd.f32 %v294_v34, %v22_v32  ;;  %v24_v38 = vld [vmem:[%s3839_s0 + $0x68] sm:$0x7f] }
   0xc   :  { %835 = vst.msk [vmem:[%s3841_s2 + $0x38] sm:$0x7f] %vm827_vm0, %v562_v24  ;;  %v295_v37 = vld [vmem:[%s3840_s1 + $0x60] sm:$0x7f]  ;;  %v296_v40 = vld [vmem:[%s3840_s1 + $0x68] sm:$0x7f] }
   0xd   :  { %836 = vst.msk [vmem:[%s3841_s2 + $0x40] sm:$0x7f] %vm827_vm0, %v563_v27  ;;  %v567_v39 = vadd.f32 %v295_v37, %v23_v35  ;;  %v25_v41 = vld [vmem:[%s3839_s0 + $0x70] sm:$0x7f]  ;;  %v568_v42 = vadd.f32 %v296_v40, %v24_v38  ;;  %v26_v44 = vld [vmem:[%s3839_s0 + $0x78] sm:$0x7f] }
   0xe   :  { %837 = vst.msk [vmem:[%s3841_s2 + $0x48] sm:$0x7f] %vm827_vm0, %v564_v30  ;;  %v297_v43 = vld [vmem:[%s3840_s1 + $0x70] sm:$0x7f]  ;;  %v298_v46 = vld [vmem:[%s3840_s1 + $0x78] sm:$0x7f] }
   0xf   :  { %838 = vst.msk [vmem:[%s3841_s2 + $0x50] sm:$0x7f] %vm827_vm0, %v565_v33  ;;  %v569_v45 = vadd.f32 %v297_v43, %v25_v41  ;;  %v27_v47 = vld [vmem:[%s3839_s0 + $0x80] sm:$0x7f]  ;;  %v570_v48 = vadd.f32 %v298_v46, %v26_v44  ;;  %v28_v50 = vld [vmem:[%s3839_s0 + $0x88] sm:$0x7f] }
  0x10   :  { %839 = vst.msk [vmem:[%s3841_s2 + $0x58] sm:$0x7f] %vm827_vm0, %v566_v36  ;;  %v299_v49 = vld [vmem:[%s3840_s1 + $0x80] sm:$0x7f]  ;;  %v300_v52 = vld [vmem:[%s3840_s1 + $0x88] sm:$0x7f] }
  0x11   :  { %840 = vst.msk [vmem:[%s3841_s2 + $0x60] sm:$0x7f] %vm827_vm0, %v567_v39  ;;  %v571_v51 = vadd.f32 %v299_v49, %v27_v47  ;;  %v29_v53 = vld [vmem:[%s3839_s0 + $0x90] sm:$0x7f]  ;;  %v572_v54 = vadd.f32 %v300_v52, %v28_v50  ;;  %v30_v56 = vld [vmem:[%s3839_s0 + $0x98] sm:$0x7f] }
  0x12   :  { %841 = vst.msk [vmem:[%s3841_s2 + $0x68] sm:$0x7f] %vm827_vm0, %v568_v42  ;;  %v301_v55 = vld [vmem:[%s3840_s1 + $0x90] sm:$0x7f]  ;;  %v302_v58 = vld [vmem:[%s3840_s1 + $0x98] sm:$0x7f] }
  0x13   :  { %842 = vst.msk [vmem:[%s3841_s2 + $0x70] sm:$0x7f] %vm827_vm0, %v569_v45  ;;  %v573_v57 = vadd.f32 %v301_v55, %v29_v53  ;;  %v31_v59 = vld [vmem:[%s3839_s0 + $0xa0] sm:$0x7f]  ;;  %v574_v60 = vadd.f32 %v302_v58, %v30_v56  ;;  %v32_v62 = vld [vmem:[%s3839_s0 + $0xa8] sm:$0x7f] }
  0x14   :  { %843 = vst.msk [vmem:[%s3841_s2 + $0x78] sm:$0x7f] %vm827_vm0, %v570_v48  ;;  %v303_v61 = vld [vmem:[%s3840_s1 + $0xa0] sm:$0x7f]  ;;  %v304_v0 = vld [vmem:[%s3840_s1 + $0xa8] sm:$0x7f] }
  0x15   :  { %844 = vst.msk [vmem:[%s3841_s2 + $0x80] sm:$0x7f] %vm827_vm0, %v571_v51  ;;  %v575_v63 = vadd.f32 %v303_v61, %v31_v59  ;;  %v33_v1 = vld [vmem:[%s3839_s0 + $0xb0] sm:$0x7f]  ;;  %v576_v2 = vadd.f32 %v304_v0, %v32_v62  ;;  %v34_v4 = vld [vmem:[%s3839_s0 + $0xb8] sm:$0x7f] }
  0x16   :  { %845 = vst.msk [vmem:[%s3841_s2 + $0x88] sm:$0x7f] %vm827_vm0, %v572_v54  ;;  %v305_v3 = vld [vmem:[%s3840_s1 + $0xb0] sm:$0x7f]  ;;  %v306_v6 = vld [vmem:[%s3840_s1 + $0xb8] sm:$0x7f] }
  0x17   :  { %846 = vst.msk [vmem:[%s3841_s2 + $0x90] sm:$0x7f] %vm827_vm0, %v573_v57  ;;  %v577_v5 = vadd.f32 %v305_v3, %v33_v1  ;;  %v35_v7 = vld [vmem:[%s3839_s0 + $0xc0] sm:$0x7f]  ;;  %v578_v8 = vadd.f32 %v306_v6, %v34_v4  ;;  %v36_v10 = vld [vmem:[%s3839_s0 + $0xc8] sm:$0x7f] }
  0x18   :  { %847 = vst.msk [vmem:[%s3841_s2 + $0x98] sm:$0x7f] %vm827_vm0, %v574_v60  ;;  %v307_v9 = vld [vmem:[%s3840_s1 + $0xc0] sm:$0x7f]  ;;  %v308_v12 = vld [vmem:[%s3840_s1 + $0xc8] sm:$0x7f] }
  0x19   :  { %848 = vst.msk [vmem:[%s3841_s2 + $0xa0] sm:$0x7f] %vm827_vm0, %v575_v63  ;;  %v579_v11 = vadd.f32 %v307_v9, %v35_v7  ;;  %v37_v13 = vld [vmem:[%s3839_s0 + $0xd0] sm:$0x7f]  ;;  %v580_v14 = vadd.f32 %v308_v12, %v36_v10  ;;  %v38_v16 = vld [vmem:[%s3839_s0 + $0xd8] sm:$0x7f] }
  0x1a   :  { %849 = vst.msk [vmem:[%s3841_s2 + $0xa8] sm:$0x7f] %vm827_vm0, %v576_v2  ;;  %v309_v15 = vld [vmem:[%s3840_s1 + $0xd0] sm:$0x7f]  ;;  %v310_v18 = vld [vmem:[%s3840_s1 + $0xd8] sm:$0x7f] }
  0x1b   :  { %850 = vst.msk [vmem:[%s3841_s2 + $0xb0] sm:$0x7f] %vm827_vm0, %v577_v5  ;;  %v581_v17 = vadd.f32 %v309_v15, %v37_v13  ;;  %v39_v19 = vld [vmem:[%s3839_s0 + $0xe0] sm:$0x7f]  ;;  %v582_v20 = vadd.f32 %v310_v18, %v38_v16  ;;  %v40_v22 = vld [vmem:[%s3839_s0 + $0xe8] sm:$0x7f] }
  0x1c   :  { %851 = vst.msk [vmem:[%s3841_s2 + $0xb8] sm:$0x7f] %vm827_vm0, %v578_v8  ;;  %v311_v21 = vld [vmem:[%s3840_s1 + $0xe0] sm:$0x7f]  ;;  %v312_v24 = vld [vmem:[%s3840_s1 + $0xe8] sm:$0x7f] }
  0x1d   :  { %852 = vst.msk [vmem:[%s3841_s2 + $0xc0] sm:$0x7f] %vm827_vm0, %v579_v11  ;;  %v583_v23 = vadd.f32 %v311_v21, %v39_v19  ;;  %v41_v25 = vld [vmem:[%s3839_s0 + $0xf0] sm:$0x7f]  ;;  %v584_v26 = vadd.f32 %v312_v24, %v40_v22  ;;  %v42_v28 = vld [vmem:[%s3839_s0 + $0xf8] sm:$0x7f] }
  0x1e   :  { %853 = vst.msk [vmem:[%s3841_s2 + $0xc8] sm:$0x7f] %vm827_vm0, %v580_v14  ;;  %v313_v27 = vld [vmem:[%s3840_s1 + $0xf0] sm:$0x7f]  ;;  %v314_v30 = vld [vmem:[%s3840_s1 + $0xf8] sm:$0x7f] }
  0x1f   :  { %854 = vst.msk [vmem:[%s3841_s2 + $0xd0] sm:$0x7f] %vm827_vm0, %v581_v17  ;;  %v585_v29 = vadd.f32 %v313_v27, %v41_v25  ;;  %v43_v31 = vld [vmem:[%s3839_s0 + $0x100] sm:$0x7f]  ;;  %v586_v32 = vadd.f32 %v314_v30, %v42_v28  ;;  %v44_v34 = vld [vmem:[%s3839_s0 + $0x108] sm:$0x7f] }
  0x20   :  { %855 = vst.msk [vmem:[%s3841_s2 + $0xd8] sm:$0x7f] %vm827_vm0, %v582_v20  ;;  %v315_v33 = vld [vmem:[%s3840_s1 + $0x100] sm:$0x7f]  ;;  %v316_v36 = vld [vmem:[%s3840_s1 + $0x108] sm:$0x7f] }
  0x21   :  { %856 = vst.msk [vmem:[%s3841_s2 + $0xe0] sm:$0x7f] %vm827_vm0, %v583_v23  ;;  %v587_v35 = vadd.f32 %v315_v33, %v43_v31  ;;  %v45_v37 = vld [vmem:[%s3839_s0 + $0x110] sm:$0x7f]  ;;  %v588_v38 = vadd.f32 %v316_v36, %v44_v34  ;;  %v46_v40 = vld [vmem:[%s3839_s0 + $0x118] sm:$0x7f] }
  0x22   :  { %857 = vst.msk [vmem:[%s3841_s2 + $0xe8] sm:$0x7f] %vm827_vm0, %v584_v26  ;;  %v317_v39 = vld [vmem:[%s3840_s1 + $0x110] sm:$0x7f]  ;;  %v318_v42 = vld [vmem:[%s3840_s1 + $0x118] sm:$0x7f] }
  0x23   :  { %858 = vst.msk [vmem:[%s3841_s2 + $0xf0] sm:$0x7f] %vm827_vm0, %v585_v29  ;;  %v589_v41 = vadd.f32 %v317_v39, %v45_v37  ;;  %v47_v43 = vld [vmem:[%s3839_s0 + $0x120] sm:$0x7f]  ;;  %v590_v44 = vadd.f32 %v318_v42, %v46_v40  ;;  %v48_v46 = vld [vmem:[%s3839_s0 + $0x128] sm:$0x7f] }
  0x24   :  { %859 = vst.msk [vmem:[%s3841_s2 + $0xf8] sm:$0x7f] %vm827_vm0, %v586_v32  ;;  %v319_v45 = vld [vmem:[%s3840_s1 + $0x120] sm:$0x7f]  ;;  %v320_v48 = vld [vmem:[%s3840_s1 + $0x128] sm:$0x7f] }
  0x25   :  { %860 = vst.msk [vmem:[%s3841_s2 + $0x100] sm:$0x7f] %vm827_vm0, %v587_v35  ;;  %v591_v47 = vadd.f32 %v319_v45, %v47_v43  ;;  %v49_v49 = vld [vmem:[%s3839_s0 + $0x130] sm:$0x7f]  ;;  %v592_v50 = vadd.f32 %v320_v48, %v48_v46  ;;  %v50_v52 = vld [vmem:[%s3839_s0 + $0x138] sm:$0x7f] }
  0x26   :  { %861 = vst.msk [vmem:[%s3841_s2 + $0x108] sm:$0x7f] %vm827_vm0, %v588_v38  ;;  %v321_v51 = vld [vmem:[%s3840_s1 + $0x130] sm:$0x7f]  ;;  %v322_v54 = vld [vmem:[%s3840_s1 + $0x138] sm:$0x7f] }
  0x27   :  { %862 = vst.msk [vmem:[%s3841_s2 + $0x110] sm:$0x7f] %vm827_vm0, %v589_v41  ;;  %v593_v53 = vadd.f32 %v321_v51, %v49_v49  ;;  %v51_v55 = vld [vmem:[%s3839_s0 + $0x140] sm:$0x7f]  ;;  %v594_v56 = vadd.f32 %v322_v54, %v50_v52  ;;  %v52_v58 = vld [vmem:[%s3839_s0 + $0x148] sm:$0x7f] }
  0x28   :  { %863 = vst.msk [vmem:[%s3841_s2 + $0x118] sm:$0x7f] %vm827_vm0, %v590_v44  ;;  %v323_v57 = vld [vmem:[%s3840_s1 + $0x140] sm:$0x7f]  ;;  %v324_v60 = vld [vmem:[%s3840_s1 + $0x148] sm:$0x7f] }
  0x29   :  { %864 = vst.msk [vmem:[%s3841_s2 + $0x120] sm:$0x7f] %vm827_vm0, %v591_v47  ;;  %v595_v59 = vadd.f32 %v323_v57, %v51_v55  ;;  %v53_v61 = vld [vmem:[%s3839_s0 + $0x150] sm:$0x7f]  ;;  %v596_v62 = vadd.f32 %v324_v60, %v52_v58  ;;  %v54_v0 = vld [vmem:[%s3839_s0 + $0x158] sm:$0x7f] }
  0x2a   :  { %865 = vst.msk [vmem:[%s3841_s2 + $0x128] sm:$0x7f] %vm827_vm0, %v592_v50  ;;  %v325_v63 = vld [vmem:[%s3840_s1 + $0x150] sm:$0x7f]  ;;  %v326_v2 = vld [vmem:[%s3840_s1 + $0x158] sm:$0x7f] }
  0x2b   :  { %866 = vst.msk [vmem:[%s3841_s2 + $0x130] sm:$0x7f] %vm827_vm0, %v593_v53  ;;  %v597_v1 = vadd.f32 %v325_v63, %v53_v61  ;;  %v55_v3 = vld [vmem:[%s3839_s0 + $0x160] sm:$0x7f]  ;;  %v598_v4 = vadd.f32 %v326_v2, %v54_v0  ;;  %v56_v6 = vld [vmem:[%s3839_s0 + $0x168] sm:$0x7f] }
  0x2c   :  { %867 = vst.msk [vmem:[%s3841_s2 + $0x138] sm:$0x7f] %vm827_vm0, %v594_v56  ;;  %v327_v5 = vld [vmem:[%s3840_s1 + $0x160] sm:$0x7f]  ;;  %v328_v8 = vld [vmem:[%s3840_s1 + $0x168] sm:$0x7f] }
  0x2d   :  { %868 = vst.msk [vmem:[%s3841_s2 + $0x140] sm:$0x7f] %vm827_vm0, %v595_v59  ;;  %v599_v7 = vadd.f32 %v327_v5, %v55_v3  ;;  %v57_v9 = vld [vmem:[%s3839_s0 + $0x170] sm:$0x7f]  ;;  %v600_v10 = vadd.f32 %v328_v8, %v56_v6  ;;  %v58_v12 = vld [vmem:[%s3839_s0 + $0x178] sm:$0x7f] }
  0x2e   :  { %869 = vst.msk [vmem:[%s3841_s2 + $0x148] sm:$0x7f] %vm827_vm0, %v596_v62  ;;  %v329_v11 = vld [vmem:[%s3840_s1 + $0x170] sm:$0x7f]  ;;  %v330_v14 = vld [vmem:[%s3840_s1 + $0x178] sm:$0x7f] }
  0x2f   :  { %870 = vst.msk [vmem:[%s3841_s2 + $0x150] sm:$0x7f] %vm827_vm0, %v597_v1  ;;  %v601_v13 = vadd.f32 %v329_v11, %v57_v9  ;;  %v59_v15 = vld [vmem:[%s3839_s0 + $0x180] sm:$0x7f]  ;;  %v602_v16 = vadd.f32 %v330_v14, %v58_v12  ;;  %v60_v18 = vld [vmem:[%s3839_s0 + $0x188] sm:$0x7f] }
  0x30   :  { %871 = vst.msk [vmem:[%s3841_s2 + $0x158] sm:$0x7f] %vm827_vm0, %v598_v4  ;;  %v331_v17 = vld [vmem:[%s3840_s1 + $0x180] sm:$0x7f]  ;;  %v332_v20 = vld [vmem:[%s3840_s1 + $0x188] sm:$0x7f] }
  0x31   :  { %872 = vst.msk [vmem:[%s3841_s2 + $0x160] sm:$0x7f] %vm827_vm0, %v599_v7  ;;  %v603_v19 = vadd.f32 %v331_v17, %v59_v15  ;;  %v61_v21 = vld [vmem:[%s3839_s0 + $0x190] sm:$0x7f]  ;;  %v604_v22 = vadd.f32 %v332_v20, %v60_v18  ;;  %v62_v24 = vld [vmem:[%s3839_s0 + $0x198] sm:$0x7f] }
  0x32   :  { %873 = vst.msk [vmem:[%s3841_s2 + $0x168] sm:$0x7f] %vm827_vm0, %v600_v10  ;;  %v333_v23 = vld [vmem:[%s3840_s1 + $0x190] sm:$0x7f]  ;;  %v334_v26 = vld [vmem:[%s3840_s1 + $0x198] sm:$0x7f] }
  0x33   :  { %874 = vst.msk [vmem:[%s3841_s2 + $0x170] sm:$0x7f] %vm827_vm0, %v601_v13  ;;  %v605_v25 = vadd.f32 %v333_v23, %v61_v21  ;;  %v63_v27 = vld [vmem:[%s3839_s0 + $0x1a0] sm:$0x7f]  ;;  %v606_v28 = vadd.f32 %v334_v26, %v62_v24  ;;  %v64_v30 = vld [vmem:[%s3839_s0 + $0x1a8] sm:$0x7f] }
  0x34   :  { %875 = vst.msk [vmem:[%s3841_s2 + $0x178] sm:$0x7f] %vm827_vm0, %v602_v16  ;;  %v335_v29 = vld [vmem:[%s3840_s1 + $0x1a0] sm:$0x7f]  ;;  %v336_v32 = vld [vmem:[%s3840_s1 + $0x1a8] sm:$0x7f] }
  0x35   :  { %876 = vst.msk [vmem:[%s3841_s2 + $0x180] sm:$0x7f] %vm827_vm0, %v603_v19  ;;  %v607_v31 = vadd.f32 %v335_v29, %v63_v27  ;;  %v65_v33 = vld [vmem:[%s3839_s0 + $0x1b0] sm:$0x7f]  ;;  %v608_v34 = vadd.f32 %v336_v32, %v64_v30  ;;  %v66_v36 = vld [vmem:[%s3839_s0 + $0x1b8] sm:$0x7f] }
  0x36   :  { %877 = vst.msk [vmem:[%s3841_s2 + $0x188] sm:$0x7f] %vm827_vm0, %v604_v22  ;;  %v337_v35 = vld [vmem:[%s3840_s1 + $0x1b0] sm:$0x7f]  ;;  %v338_v38 = vld [vmem:[%s3840_s1 + $0x1b8] sm:$0x7f] }
  0x37   :  { %878 = vst.msk [vmem:[%s3841_s2 + $0x190] sm:$0x7f] %vm827_vm0, %v605_v25  ;;  %v609_v37 = vadd.f32 %v337_v35, %v65_v33  ;;  %v67_v39 = vld [vmem:[%s3839_s0 + $0x1c0] sm:$0x7f]  ;;  %v610_v40 = vadd.f32 %v338_v38, %v66_v36  ;;  %v68_v42 = vld [vmem:[%s3839_s0 + $0x1c8] sm:$0x7f] }
  0x38   :  { %879 = vst.msk [vmem:[%s3841_s2 + $0x198] sm:$0x7f] %vm827_vm0, %v606_v28  ;;  %v339_v41 = vld [vmem:[%s3840_s1 + $0x1c0] sm:$0x7f]  ;;  %v340_v44 = vld [vmem:[%s3840_s1 + $0x1c8] sm:$0x7f] }
  0x39   :  { %880 = vst.msk [vmem:[%s3841_s2 + $0x1a0] sm:$0x7f] %vm827_vm0, %v607_v31  ;;  %v611_v43 = vadd.f32 %v339_v41, %v67_v39  ;;  %v69_v45 = vld [vmem:[%s3839_s0 + $0x1d0] sm:$0x7f]  ;;  %v612_v46 = vadd.f32 %v340_v44, %v68_v42  ;;  %v70_v48 = vld [vmem:[%s3839_s0 + $0x1d8] sm:$0x7f] }
  0x3a   :  { %881 = vst.msk [vmem:[%s3841_s2 + $0x1a8] sm:$0x7f] %vm827_vm0, %v608_v34  ;;  %v341_v47 = vld [vmem:[%s3840_s1 + $0x1d0] sm:$0x7f]  ;;  %v342_v50 = vld [vmem:[%s3840_s1 + $0x1d8] sm:$0x7f] }
  0x3b   :  { %882 = vst.msk [vmem:[%s3841_s2 + $0x1b0] sm:$0x7f] %vm827_vm0, %v609_v37  ;;  %v613_v49 = vadd.f32 %v341_v47, %v69_v45  ;;  %v71_v51 = vld [vmem:[%s3839_s0 + $0x1e0] sm:$0x7f]  ;;  %v614_v52 = vadd.f32 %v342_v50, %v70_v48  ;;  %v72_v54 = vld [vmem:[%s3839_s0 + $0x1e8] sm:$0x7f] }
  0x3c   :  { %883 = vst.msk [vmem:[%s3841_s2 + $0x1b8] sm:$0x7f] %vm827_vm0, %v610_v40  ;;  %v343_v53 = vld [vmem:[%s3840_s1 + $0x1e0] sm:$0x7f]  ;;  %v344_v56 = vld [vmem:[%s3840_s1 + $0x1e8] sm:$0x7f] }
  0x3d   :  { %884 = vst.msk [vmem:[%s3841_s2 + $0x1c0] sm:$0x7f] %vm827_vm0, %v611_v43  ;;  %v615_v55 = vadd.f32 %v343_v53, %v71_v51  ;;  %v73_v57 = vld [vmem:[%s3839_s0 + $0x1f0] sm:$0x7f]  ;;  %v616_v58 = vadd.f32 %v344_v56, %v72_v54  ;;  %v74_v60 = vld [vmem:[%s3839_s0 + $0x1f8] sm:$0x7f] }
  0x3e   :  { %885 = vst.msk [vmem:[%s3841_s2 + $0x1c8] sm:$0x7f] %vm827_vm0, %v612_v46  ;;  %v345_v59 = vld [vmem:[%s3840_s1 + $0x1f0] sm:$0x7f]  ;;  %v346_v62 = vld [vmem:[%s3840_s1 + $0x1f8] sm:$0x7f] }
  0x3f   :  { %886 = vst.msk [vmem:[%s3841_s2 + $0x1d0] sm:$0x7f] %vm827_vm0, %v613_v49  ;;  %v617_v61 = vadd.f32 %v345_v59, %v73_v57  ;;  %v75_v63 = vld [vmem:[%s3839_s0 + $0x200] sm:$0x7f]  ;;  %v618_v0 = vadd.f32 %v346_v62, %v74_v60  ;;  %v76_v2 = vld [vmem:[%s3839_s0 + $0x208] sm:$0x7f] }
  0x40   :  { %887 = vst.msk [vmem:[%s3841_s2 + $0x1d8] sm:$0x7f] %vm827_vm0, %v614_v52  ;;  %v347_v1 = vld [vmem:[%s3840_s1 + $0x200] sm:$0x7f]  ;;  %v348_v4 = vld [vmem:[%s3840_s1 + $0x208] sm:$0x7f] }
  0x41   :  { %888 = vst.msk [vmem:[%s3841_s2 + $0x1e0] sm:$0x7f] %vm827_vm0, %v615_v55  ;;  %v619_v3 = vadd.f32 %v347_v1, %v75_v63  ;;  %v77_v5 = vld [vmem:[%s3839_s0 + $0x210] sm:$0x7f]  ;;  %v620_v6 = vadd.f32 %v348_v4, %v76_v2  ;;  %v78_v8 = vld [vmem:[%s3839_s0 + $0x218] sm:$0x7f] }
  0x42   :  { %889 = vst.msk [vmem:[%s3841_s2 + $0x1e8] sm:$0x7f] %vm827_vm0, %v616_v58  ;;  %v349_v7 = vld [vmem:[%s3840_s1 + $0x210] sm:$0x7f]  ;;  %v350_v10 = vld [vmem:[%s3840_s1 + $0x218] sm:$0x7f] }
  0x43   :  { %890 = vst.msk [vmem:[%s3841_s2 + $0x1f0] sm:$0x7f] %vm827_vm0, %v617_v61  ;;  %v621_v9 = vadd.f32 %v349_v7, %v77_v5  ;;  %v79_v11 = vld [vmem:[%s3839_s0 + $0x220] sm:$0x7f]  ;;  %v622_v12 = vadd.f32 %v350_v10, %v78_v8  ;;  %v80_v14 = vld [vmem:[%s3839_s0 + $0x228] sm:$0x7f] }
  0x44   :  { %891 = vst.msk [vmem:[%s3841_s2 + $0x1f8] sm:$0x7f] %vm827_vm0, %v618_v0  ;;  %v351_v13 = vld [vmem:[%s3840_s1 + $0x220] sm:$0x7f]  ;;  %v352_v16 = vld [vmem:[%s3840_s1 + $0x228] sm:$0x7f] }
  0x45   :  { %892 = vst.msk [vmem:[%s3841_s2 + $0x200] sm:$0x7f] %vm827_vm0, %v619_v3  ;;  %v623_v15 = vadd.f32 %v351_v13, %v79_v11  ;;  %v81_v17 = vld [vmem:[%s3839_s0 + $0x230] sm:$0x7f]  ;;  %v624_v18 = vadd.f32 %v352_v16, %v80_v14  ;;  %v82_v20 = vld [vmem:[%s3839_s0 + $0x238] sm:$0x7f] }
  0x46   :  { %893 = vst.msk [vmem:[%s3841_s2 + $0x208] sm:$0x7f] %vm827_vm0, %v620_v6  ;;  %v353_v19 = vld [vmem:[%s3840_s1 + $0x230] sm:$0x7f]  ;;  %v354_v22 = vld [vmem:[%s3840_s1 + $0x238] sm:$0x7f] }
  0x47   :  { %894 = vst.msk [vmem:[%s3841_s2 + $0x210] sm:$0x7f] %vm827_vm0, %v621_v9  ;;  %v625_v21 = vadd.f32 %v353_v19, %v81_v17  ;;  %v83_v23 = vld [vmem:[%s3839_s0 + $0x240] sm:$0x7f]  ;;  %v626_v24 = vadd.f32 %v354_v22, %v82_v20  ;;  %v84_v26 = vld [vmem:[%s3839_s0 + $0x248] sm:$0x7f] }
  0x48   :  { %895 = vst.msk [vmem:[%s3841_s2 + $0x218] sm:$0x7f] %vm827_vm0, %v622_v12  ;;  %v355_v25 = vld [vmem:[%s3840_s1 + $0x240] sm:$0x7f]  ;;  %v356_v28 = vld [vmem:[%s3840_s1 + $0x248] sm:$0x7f] }
  0x49   :  { %896 = vst.msk [vmem:[%s3841_s2 + $0x220] sm:$0x7f] %vm827_vm0, %v623_v15  ;;  %v627_v27 = vadd.f32 %v355_v25, %v83_v23  ;;  %v85_v29 = vld [vmem:[%s3839_s0 + $0x250] sm:$0x7f]  ;;  %v628_v30 = vadd.f32 %v356_v28, %v84_v26  ;;  %v86_v32 = vld [vmem:[%s3839_s0 + $0x258] sm:$0x7f] }
  0x4a   :  { %897 = vst.msk [vmem:[%s3841_s2 + $0x228] sm:$0x7f] %vm827_vm0, %v624_v18  ;;  %v357_v31 = vld [vmem:[%s3840_s1 + $0x250] sm:$0x7f]  ;;  %v358_v34 = vld [vmem:[%s3840_s1 + $0x258] sm:$0x7f] }
  0x4b   :  { %898 = vst.msk [vmem:[%s3841_s2 + $0x230] sm:$0x7f] %vm827_vm0, %v625_v21  ;;  %v629_v33 = vadd.f32 %v357_v31, %v85_v29  ;;  %v87_v35 = vld [vmem:[%s3839_s0 + $0x260] sm:$0x7f]  ;;  %v630_v36 = vadd.f32 %v358_v34, %v86_v32  ;;  %v88_v38 = vld [vmem:[%s3839_s0 + $0x268] sm:$0x7f] }
  0x4c   :  { %899 = vst.msk [vmem:[%s3841_s2 + $0x238] sm:$0x7f] %vm827_vm0, %v626_v24  ;;  %v359_v37 = vld [vmem:[%s3840_s1 + $0x260] sm:$0x7f]  ;;  %v360_v40 = vld [vmem:[%s3840_s1 + $0x268] sm:$0x7f] }
  0x4d   :  { %900 = vst.msk [vmem:[%s3841_s2 + $0x240] sm:$0x7f] %vm827_vm0, %v627_v27  ;;  %v631_v39 = vadd.f32 %v359_v37, %v87_v35  ;;  %v89_v41 = vld [vmem:[%s3839_s0 + $0x270] sm:$0x7f]  ;;  %v632_v42 = vadd.f32 %v360_v40, %v88_v38  ;;  %v90_v44 = vld [vmem:[%s3839_s0 + $0x278] sm:$0x7f] }
  0x4e   :  { %901 = vst.msk [vmem:[%s3841_s2 + $0x248] sm:$0x7f] %vm827_vm0, %v628_v30  ;;  %v361_v43 = vld [vmem:[%s3840_s1 + $0x270] sm:$0x7f]  ;;  %v362_v46 = vld [vmem:[%s3840_s1 + $0x278] sm:$0x7f] }
  0x4f   :  { %902 = vst.msk [vmem:[%s3841_s2 + $0x250] sm:$0x7f] %vm827_vm0, %v629_v33  ;;  %v633_v45 = vadd.f32 %v361_v43, %v89_v41  ;;  %v91_v47 = vld [vmem:[%s3839_s0 + $0x280] sm:$0x7f]  ;;  %v634_v48 = vadd.f32 %v362_v46, %v90_v44  ;;  %v92_v50 = vld [vmem:[%s3839_s0 + $0x288] sm:$0x7f] }
  0x50   :  { %903 = vst.msk [vmem:[%s3841_s2 + $0x258] sm:$0x7f] %vm827_vm0, %v630_v36  ;;  %v363_v49 = vld [vmem:[%s3840_s1 + $0x280] sm:$0x7f]  ;;  %v364_v52 = vld [vmem:[%s3840_s1 + $0x288] sm:$0x7f] }
  0x51   :  { %904 = vst.msk [vmem:[%s3841_s2 + $0x260] sm:$0x7f] %vm827_vm0, %v631_v39  ;;  %v635_v51 = vadd.f32 %v363_v49, %v91_v47  ;;  %v93_v53 = vld [vmem:[%s3839_s0 + $0x290] sm:$0x7f]  ;;  %v636_v54 = vadd.f32 %v364_v52, %v92_v50  ;;  %v94_v56 = vld [vmem:[%s3839_s0 + $0x298] sm:$0x7f] }
  0x52   :  { %905 = vst.msk [vmem:[%s3841_s2 + $0x268] sm:$0x7f] %vm827_vm0, %v632_v42  ;;  %v365_v55 = vld [vmem:[%s3840_s1 + $0x290] sm:$0x7f]  ;;  %v366_v58 = vld [vmem:[%s3840_s1 + $0x298] sm:$0x7f] }
  0x53   :  { %906 = vst.msk [vmem:[%s3841_s2 + $0x270] sm:$0x7f] %vm827_vm0, %v633_v45  ;;  %v637_v57 = vadd.f32 %v365_v55, %v93_v53  ;;  %v95_v59 = vld [vmem:[%s3839_s0 + $0x2a0] sm:$0x7f]  ;;  %v638_v60 = vadd.f32 %v366_v58, %v94_v56  ;;  %v96_v62 = vld [vmem:[%s3839_s0 + $0x2a8] sm:$0x7f] }
  0x54   :  { %907 = vst.msk [vmem:[%s3841_s2 + $0x278] sm:$0x7f] %vm827_vm0, %v634_v48  ;;  %v367_v61 = vld [vmem:[%s3840_s1 + $0x2a0] sm:$0x7f]  ;;  %v368_v0 = vld [vmem:[%s3840_s1 + $0x2a8] sm:$0x7f] }
  0x55   :  { %908 = vst.msk [vmem:[%s3841_s2 + $0x280] sm:$0x7f] %vm827_vm0, %v635_v51  ;;  %v639_v63 = vadd.f32 %v367_v61, %v95_v59  ;;  %v97_v1 = vld [vmem:[%s3839_s0 + $0x2b0] sm:$0x7f]  ;;  %v640_v2 = vadd.f32 %v368_v0, %v96_v62  ;;  %v98_v4 = vld [vmem:[%s3839_s0 + $0x2b8] sm:$0x7f] }
  0x56   :  { %909 = vst.msk [vmem:[%s3841_s2 + $0x288] sm:$0x7f] %vm827_vm0, %v636_v54  ;;  %v369_v3 = vld [vmem:[%s3840_s1 + $0x2b0] sm:$0x7f]  ;;  %v370_v6 = vld [vmem:[%s3840_s1 + $0x2b8] sm:$0x7f] }
  0x57   :  { %910 = vst.msk [vmem:[%s3841_s2 + $0x290] sm:$0x7f] %vm827_vm0, %v637_v57  ;;  %v641_v5 = vadd.f32 %v369_v3, %v97_v1  ;;  %v99_v7 = vld [vmem:[%s3839_s0 + $0x2c0] sm:$0x7f]  ;;  %v642_v8 = vadd.f32 %v370_v6, %v98_v4  ;;  %v100_v10 = vld [vmem:[%s3839_s0 + $0x2c8] sm:$0x7f] }
  0x58   :  { %911 = vst.msk [vmem:[%s3841_s2 + $0x298] sm:$0x7f] %vm827_vm0, %v638_v60  ;;  %v371_v9 = vld [vmem:[%s3840_s1 + $0x2c0] sm:$0x7f]  ;;  %v372_v12 = vld [vmem:[%s3840_s1 + $0x2c8] sm:$0x7f] }
  0x59   :  { %912 = vst.msk [vmem:[%s3841_s2 + $0x2a0] sm:$0x7f] %vm827_vm0, %v639_v63  ;;  %v643_v11 = vadd.f32 %v371_v9, %v99_v7  ;;  %v101_v13 = vld [vmem:[%s3839_s0 + $0x2d0] sm:$0x7f]  ;;  %v644_v14 = vadd.f32 %v372_v12, %v100_v10  ;;  %v102_v16 = vld [vmem:[%s3839_s0 + $0x2d8] sm:$0x7f] }
  0x5a   :  { %913 = vst.msk [vmem:[%s3841_s2 + $0x2a8] sm:$0x7f] %vm827_vm0, %v640_v2  ;;  %v373_v15 = vld [vmem:[%s3840_s1 + $0x2d0] sm:$0x7f]  ;;  %v374_v18 = vld [vmem:[%s3840_s1 + $0x2d8] sm:$0x7f] }
  0x5b   :  { %914 = vst.msk [vmem:[%s3841_s2 + $0x2b0] sm:$0x7f] %vm827_vm0, %v641_v5  ;;  %v645_v17 = vadd.f32 %v373_v15, %v101_v13  ;;  %v103_v19 = vld [vmem:[%s3839_s0 + $0x2e0] sm:$0x7f]  ;;  %v646_v20 = vadd.f32 %v374_v18, %v102_v16  ;;  %v104_v22 = vld [vmem:[%s3839_s0 + $0x2e8] sm:$0x7f] }
  0x5c   :  { %915 = vst.msk [vmem:[%s3841_s2 + $0x2b8] sm:$0x7f] %vm827_vm0, %v642_v8  ;;  %v375_v21 = vld [vmem:[%s3840_s1 + $0x2e0] sm:$0x7f]  ;;  %v376_v24 = vld [vmem:[%s3840_s1 + $0x2e8] sm:$0x7f] }
  0x5d   :  { %916 = vst.msk [vmem:[%s3841_s2 + $0x2c0] sm:$0x7f] %vm827_vm0, %v643_v11  ;;  %v647_v23 = vadd.f32 %v375_v21, %v103_v19  ;;  %v105_v25 = vld [vmem:[%s3839_s0 + $0x2f0] sm:$0x7f]  ;;  %v648_v26 = vadd.f32 %v376_v24, %v104_v22  ;;  %v106_v28 = vld [vmem:[%s3839_s0 + $0x2f8] sm:$0x7f] }
  0x5e   :  { %917 = vst.msk [vmem:[%s3841_s2 + $0x2c8] sm:$0x7f] %vm827_vm0, %v644_v14  ;;  %v377_v27 = vld [vmem:[%s3840_s1 + $0x2f0] sm:$0x7f]  ;;  %v378_v30 = vld [vmem:[%s3840_s1 + $0x2f8] sm:$0x7f] }
  0x5f   :  { %918 = vst.msk [vmem:[%s3841_s2 + $0x2d0] sm:$0x7f] %vm827_vm0, %v645_v17  ;;  %v649_v29 = vadd.f32 %v377_v27, %v105_v25  ;;  %v107_v31 = vld [vmem:[%s3839_s0 + $0x300] sm:$0x7f]  ;;  %v650_v32 = vadd.f32 %v378_v30, %v106_v28  ;;  %v108_v34 = vld [vmem:[%s3839_s0 + $0x308] sm:$0x7f] }
  0x60   :  { %919 = vst.msk [vmem:[%s3841_s2 + $0x2d8] sm:$0x7f] %vm827_vm0, %v646_v20  ;;  %v379_v33 = vld [vmem:[%s3840_s1 + $0x300] sm:$0x7f]  ;;  %v380_v36 = vld [vmem:[%s3840_s1 + $0x308] sm:$0x7f] }
  0x61   :  { %920 = vst.msk [vmem:[%s3841_s2 + $0x2e0] sm:$0x7f] %vm827_vm0, %v647_v23  ;;  %v651_v35 = vadd.f32 %v379_v33, %v107_v31  ;;  %v109_v37 = vld [vmem:[%s3839_s0 + $0x310] sm:$0x7f]  ;;  %v652_v38 = vadd.f32 %v380_v36, %v108_v34  ;;  %v110_v40 = vld [vmem:[%s3839_s0 + $0x318] sm:$0x7f] }
  0x62   :  { %921 = vst.msk [vmem:[%s3841_s2 + $0x2e8] sm:$0x7f] %vm827_vm0, %v648_v26  ;;  %v381_v39 = vld [vmem:[%s3840_s1 + $0x310] sm:$0x7f]  ;;  %v382_v42 = vld [vmem:[%s3840_s1 + $0x318] sm:$0x7f] }
  0x63   :  { %922 = vst.msk [vmem:[%s3841_s2 + $0x2f0] sm:$0x7f] %vm827_vm0, %v649_v29  ;;  %v653_v41 = vadd.f32 %v381_v39, %v109_v37  ;;  %v111_v43 = vld [vmem:[%s3839_s0 + $0x320] sm:$0x7f]  ;;  %v654_v44 = vadd.f32 %v382_v42, %v110_v40  ;;  %v112_v46 = vld [vmem:[%s3839_s0 + $0x328] sm:$0x7f] }
  0x64   :  { %923 = vst.msk [vmem:[%s3841_s2 + $0x2f8] sm:$0x7f] %vm827_vm0, %v650_v32  ;;  %v383_v45 = vld [vmem:[%s3840_s1 + $0x320] sm:$0x7f]  ;;  %v384_v48 = vld [vmem:[%s3840_s1 + $0x328] sm:$0x7f] }
  0x65   :  { %924 = vst.msk [vmem:[%s3841_s2 + $0x300] sm:$0x7f] %vm827_vm0, %v651_v35  ;;  %v655_v47 = vadd.f32 %v383_v45, %v111_v43  ;;  %v113_v49 = vld [vmem:[%s3839_s0 + $0x330] sm:$0x7f]  ;;  %v656_v50 = vadd.f32 %v384_v48, %v112_v46  ;;  %v114_v52 = vld [vmem:[%s3839_s0 + $0x338] sm:$0x7f] }
  0x66   :  { %925 = vst.msk [vmem:[%s3841_s2 + $0x308] sm:$0x7f] %vm827_vm0, %v652_v38  ;;  %v385_v51 = vld [vmem:[%s3840_s1 + $0x330] sm:$0x7f]  ;;  %v386_v54 = vld [vmem:[%s3840_s1 + $0x338] sm:$0x7f] }
  0x67   :  { %926 = vst.msk [vmem:[%s3841_s2 + $0x310] sm:$0x7f] %vm827_vm0, %v653_v41  ;;  %v657_v53 = vadd.f32 %v385_v51, %v113_v49  ;;  %v115_v55 = vld [vmem:[%s3839_s0 + $0x340] sm:$0x7f]  ;;  %v658_v56 = vadd.f32 %v386_v54, %v114_v52  ;;  %v116_v58 = vld [vmem:[%s3839_s0 + $0x348] sm:$0x7f] }
  0x68   :  { %927 = vst.msk [vmem:[%s3841_s2 + $0x318] sm:$0x7f] %vm827_vm0, %v654_v44  ;;  %v387_v57 = vld [vmem:[%s3840_s1 + $0x340] sm:$0x7f]  ;;  %v388_v60 = vld [vmem:[%s3840_s1 + $0x348] sm:$0x7f] }
  0x69   :  { %928 = vst.msk [vmem:[%s3841_s2 + $0x320] sm:$0x7f] %vm827_vm0, %v655_v47  ;;  %v659_v59 = vadd.f32 %v387_v57, %v115_v55  ;;  %v117_v61 = vld [vmem:[%s3839_s0 + $0x350] sm:$0x7f]  ;;  %v660_v62 = vadd.f32 %v388_v60, %v116_v58  ;;  %v118_v0 = vld [vmem:[%s3839_s0 + $0x358] sm:$0x7f] }
  0x6a   :  { %929 = vst.msk [vmem:[%s3841_s2 + $0x328] sm:$0x7f] %vm827_vm0, %v656_v50  ;;  %v389_v63 = vld [vmem:[%s3840_s1 + $0x350] sm:$0x7f]  ;;  %v390_v2 = vld [vmem:[%s3840_s1 + $0x358] sm:$0x7f] }
  0x6b   :  { %930 = vst.msk [vmem:[%s3841_s2 + $0x330] sm:$0x7f] %vm827_vm0, %v657_v53  ;;  %v661_v1 = vadd.f32 %v389_v63, %v117_v61  ;;  %v119_v3 = vld [vmem:[%s3839_s0 + $0x360] sm:$0x7f]  ;;  %v662_v4 = vadd.f32 %v390_v2, %v118_v0  ;;  %v120_v6 = vld [vmem:[%s3839_s0 + $0x368] sm:$0x7f] }
  0x6c   :  { %931 = vst.msk [vmem:[%s3841_s2 + $0x338] sm:$0x7f] %vm827_vm0, %v658_v56  ;;  %v391_v5 = vld [vmem:[%s3840_s1 + $0x360] sm:$0x7f]  ;;  %v392_v8 = vld [vmem:[%s3840_s1 + $0x368] sm:$0x7f] }
  0x6d   :  { %932 = vst.msk [vmem:[%s3841_s2 + $0x340] sm:$0x7f] %vm827_vm0, %v659_v59  ;;  %v663_v7 = vadd.f32 %v391_v5, %v119_v3  ;;  %v121_v9 = vld [vmem:[%s3839_s0 + $0x370] sm:$0x7f]  ;;  %v664_v10 = vadd.f32 %v392_v8, %v120_v6  ;;  %v122_v12 = vld [vmem:[%s3839_s0 + $0x378] sm:$0x7f] }
  0x6e   :  { %933 = vst.msk [vmem:[%s3841_s2 + $0x348] sm:$0x7f] %vm827_vm0, %v660_v62  ;;  %v393_v11 = vld [vmem:[%s3840_s1 + $0x370] sm:$0x7f]  ;;  %v394_v14 = vld [vmem:[%s3840_s1 + $0x378] sm:$0x7f] }
  0x6f   :  { %934 = vst.msk [vmem:[%s3841_s2 + $0x350] sm:$0x7f] %vm827_vm0, %v661_v1  ;;  %v665_v13 = vadd.f32 %v393_v11, %v121_v9  ;;  %v123_v15 = vld [vmem:[%s3839_s0 + $0x380] sm:$0x7f]  ;;  %v666_v16 = vadd.f32 %v394_v14, %v122_v12  ;;  %v124_v18 = vld [vmem:[%s3839_s0 + $0x388] sm:$0x7f] }
  0x70   :  { %935 = vst.msk [vmem:[%s3841_s2 + $0x358] sm:$0x7f] %vm827_vm0, %v662_v4  ;;  %v395_v17 = vld [vmem:[%s3840_s1 + $0x380] sm:$0x7f]  ;;  %v396_v20 = vld [vmem:[%s3840_s1 + $0x388] sm:$0x7f] }
  0x71   :  { %936 = vst.msk [vmem:[%s3841_s2 + $0x360] sm:$0x7f] %vm827_vm0, %v663_v7  ;;  %v667_v19 = vadd.f32 %v395_v17, %v123_v15  ;;  %v125_v21 = vld [vmem:[%s3839_s0 + $0x390] sm:$0x7f]  ;;  %v668_v22 = vadd.f32 %v396_v20, %v124_v18  ;;  %v126_v24 = vld [vmem:[%s3839_s0 + $0x398] sm:$0x7f] }
  0x72   :  { %937 = vst.msk [vmem:[%s3841_s2 + $0x368] sm:$0x7f] %vm827_vm0, %v664_v10  ;;  %v397_v23 = vld [vmem:[%s3840_s1 + $0x390] sm:$0x7f]  ;;  %v398_v26 = vld [vmem:[%s3840_s1 + $0x398] sm:$0x7f] }
  0x73   :  { %938 = vst.msk [vmem:[%s3841_s2 + $0x370] sm:$0x7f] %vm827_vm0, %v665_v13  ;;  %v669_v25 = vadd.f32 %v397_v23, %v125_v21  ;;  %v127_v27 = vld [vmem:[%s3839_s0 + $0x3a0] sm:$0x7f]  ;;  %v670_v28 = vadd.f32 %v398_v26, %v126_v24  ;;  %v128_v30 = vld [vmem:[%s3839_s0 + $0x3a8] sm:$0x7f] }
  0x74   :  { %939 = vst.msk [vmem:[%s3841_s2 + $0x378] sm:$0x7f] %vm827_vm0, %v666_v16  ;;  %v399_v29 = vld [vmem:[%s3840_s1 + $0x3a0] sm:$0x7f]  ;;  %v400_v32 = vld [vmem:[%s3840_s1 + $0x3a8] sm:$0x7f] }
  0x75   :  { %940 = vst.msk [vmem:[%s3841_s2 + $0x380] sm:$0x7f] %vm827_vm0, %v667_v19  ;;  %v671_v31 = vadd.f32 %v399_v29, %v127_v27  ;;  %v129_v33 = vld [vmem:[%s3839_s0 + $0x3b0] sm:$0x7f]  ;;  %v672_v34 = vadd.f32 %v400_v32, %v128_v30  ;;  %v130_v36 = vld [vmem:[%s3839_s0 + $0x3b8] sm:$0x7f] }
  0x76   :  { %941 = vst.msk [vmem:[%s3841_s2 + $0x388] sm:$0x7f] %vm827_vm0, %v668_v22  ;;  %v401_v35 = vld [vmem:[%s3840_s1 + $0x3b0] sm:$0x7f]  ;;  %v402_v38 = vld [vmem:[%s3840_s1 + $0x3b8] sm:$0x7f] }
  0x77   :  { %942 = vst.msk [vmem:[%s3841_s2 + $0x390] sm:$0x7f] %vm827_vm0, %v669_v25  ;;  %v673_v37 = vadd.f32 %v401_v35, %v129_v33  ;;  %v131_v39 = vld [vmem:[%s3839_s0 + $0x3c0] sm:$0x7f]  ;;  %v674_v40 = vadd.f32 %v402_v38, %v130_v36  ;;  %v132_v42 = vld [vmem:[%s3839_s0 + $0x3c8] sm:$0x7f] }
  0x78   :  { %943 = vst.msk [vmem:[%s3841_s2 + $0x398] sm:$0x7f] %vm827_vm0, %v670_v28  ;;  %v403_v41 = vld [vmem:[%s3840_s1 + $0x3c0] sm:$0x7f]  ;;  %v404_v44 = vld [vmem:[%s3840_s1 + $0x3c8] sm:$0x7f] }
  0x79   :  { %944 = vst.msk [vmem:[%s3841_s2 + $0x3a0] sm:$0x7f] %vm827_vm0, %v671_v31  ;;  %v675_v43 = vadd.f32 %v403_v41, %v131_v39  ;;  %v133_v45 = vld [vmem:[%s3839_s0 + $0x3d0] sm:$0x7f]  ;;  %v676_v46 = vadd.f32 %v404_v44, %v132_v42  ;;  %v134_v48 = vld [vmem:[%s3839_s0 + $0x3d8] sm:$0x7f] }
  0x7a   :  { %945 = vst.msk [vmem:[%s3841_s2 + $0x3a8] sm:$0x7f] %vm827_vm0, %v672_v34  ;;  %v405_v47 = vld [vmem:[%s3840_s1 + $0x3d0] sm:$0x7f]  ;;  %v406_v50 = vld [vmem:[%s3840_s1 + $0x3d8] sm:$0x7f] }
  0x7b   :  { %946 = vst.msk [vmem:[%s3841_s2 + $0x3b0] sm:$0x7f] %vm827_vm0, %v673_v37  ;;  %v677_v49 = vadd.f32 %v405_v47, %v133_v45  ;;  %v135_v51 = vld [vmem:[%s3839_s0 + $0x3e0] sm:$0x7f]  ;;  %v678_v52 = vadd.f32 %v406_v50, %v134_v48  ;;  %v136_v54 = vld [vmem:[%s3839_s0 + $0x3e8] sm:$0x7f] }
  0x7c   :  { %947 = vst.msk [vmem:[%s3841_s2 + $0x3b8] sm:$0x7f] %vm827_vm0, %v674_v40  ;;  %v407_v53 = vld [vmem:[%s3840_s1 + $0x3e0] sm:$0x7f]  ;;  %v408_v56 = vld [vmem:[%s3840_s1 + $0x3e8] sm:$0x7f] }
  0x7d   :  { %948 = vst.msk [vmem:[%s3841_s2 + $0x3c0] sm:$0x7f] %vm827_vm0, %v675_v43  ;;  %v679_v55 = vadd.f32 %v407_v53, %v135_v51  ;;  %v137_v57 = vld [vmem:[%s3839_s0 + $0x3f0] sm:$0x7f]  ;;  %v680_v58 = vadd.f32 %v408_v56, %v136_v54  ;;  %v138_v60 = vld [vmem:[%s3839_s0 + $0x3f8] sm:$0x7f] }
  0x7e   :  { %949 = vst.msk [vmem:[%s3841_s2 + $0x3c8] sm:$0x7f] %vm827_vm0, %v676_v46  ;;  %v409_v59 = vld [vmem:[%s3840_s1 + $0x3f0] sm:$0x7f]  ;;  %v410_v62 = vld [vmem:[%s3840_s1 + $0x3f8] sm:$0x7f] }
  0x7f   :  { %950 = vst.msk [vmem:[%s3841_s2 + $0x3d0] sm:$0x7f] %vm827_vm0, %v677_v49  ;;  %v681_v61 = vadd.f32 %v409_v59, %v137_v57  ;;  %v139_v63 = vld [vmem:[%s3839_s0 + $0x400] sm:$0x7f]  ;;  %v682_v0 = vadd.f32 %v410_v62, %v138_v60  ;;  %v140_v2 = vld [vmem:[%s3839_s0 + $0x408] sm:$0x7f] }
  0x80   :  { %951 = vst.msk [vmem:[%s3841_s2 + $0x3d8] sm:$0x7f] %vm827_vm0, %v678_v52  ;;  %v411_v1 = vld [vmem:[%s3840_s1 + $0x400] sm:$0x7f]  ;;  %v412_v4 = vld [vmem:[%s3840_s1 + $0x408] sm:$0x7f] }
  0x81   :  { %952 = vst.msk [vmem:[%s3841_s2 + $0x3e0] sm:$0x7f] %vm827_vm0, %v679_v55  ;;  %v683_v3 = vadd.f32 %v411_v1, %v139_v63  ;;  %v141_v5 = vld [vmem:[%s3839_s0 + $0x410] sm:$0x7f]  ;;  %v684_v6 = vadd.f32 %v412_v4, %v140_v2  ;;  %v142_v8 = vld [vmem:[%s3839_s0 + $0x418] sm:$0x7f] }
  0x82   :  { %953 = vst.msk [vmem:[%s3841_s2 + $0x3e8] sm:$0x7f] %vm827_vm0, %v680_v58  ;;  %v413_v7 = vld [vmem:[%s3840_s1 + $0x410] sm:$0x7f]  ;;  %v414_v10 = vld [vmem:[%s3840_s1 + $0x418] sm:$0x7f] }
  0x83   :  { %954 = vst.msk [vmem:[%s3841_s2 + $0x3f0] sm:$0x7f] %vm827_vm0, %v681_v61  ;;  %v685_v9 = vadd.f32 %v413_v7, %v141_v5  ;;  %v143_v11 = vld [vmem:[%s3839_s0 + $0x420] sm:$0x7f]  ;;  %v686_v12 = vadd.f32 %v414_v10, %v142_v8  ;;  %v144_v14 = vld [vmem:[%s3839_s0 + $0x428] sm:$0x7f] }
  0x84   :  { %955 = vst.msk [vmem:[%s3841_s2 + $0x3f8] sm:$0x7f] %vm827_vm0, %v682_v0  ;;  %v415_v13 = vld [vmem:[%s3840_s1 + $0x420] sm:$0x7f]  ;;  %v416_v16 = vld [vmem:[%s3840_s1 + $0x428] sm:$0x7f] }
  0x85   :  { %956 = vst.msk [vmem:[%s3841_s2 + $0x400] sm:$0x7f] %vm827_vm0, %v683_v3  ;;  %v687_v15 = vadd.f32 %v415_v13, %v143_v11  ;;  %v145_v17 = vld [vmem:[%s3839_s0 + $0x430] sm:$0x7f]  ;;  %v688_v18 = vadd.f32 %v416_v16, %v144_v14  ;;  %v146_v20 = vld [vmem:[%s3839_s0 + $0x438] sm:$0x7f] }
  0x86   :  { %957 = vst.msk [vmem:[%s3841_s2 + $0x408] sm:$0x7f] %vm827_vm0, %v684_v6  ;;  %v417_v19 = vld [vmem:[%s3840_s1 + $0x430] sm:$0x7f]  ;;  %v418_v22 = vld [vmem:[%s3840_s1 + $0x438] sm:$0x7f] }
  0x87   :  { %958 = vst.msk [vmem:[%s3841_s2 + $0x410] sm:$0x7f] %vm827_vm0, %v685_v9  ;;  %v689_v21 = vadd.f32 %v417_v19, %v145_v17  ;;  %v147_v23 = vld [vmem:[%s3839_s0 + $0x440] sm:$0x7f]  ;;  %v690_v24 = vadd.f32 %v418_v22, %v146_v20  ;;  %v148_v26 = vld [vmem:[%s3839_s0 + $0x448] sm:$0x7f] }
  0x88   :  { %959 = vst.msk [vmem:[%s3841_s2 + $0x418] sm:$0x7f] %vm827_vm0, %v686_v12  ;;  %v419_v25 = vld [vmem:[%s3840_s1 + $0x440] sm:$0x7f]  ;;  %v420_v28 = vld [vmem:[%s3840_s1 + $0x448] sm:$0x7f] }
  0x89   :  { %960 = vst.msk [vmem:[%s3841_s2 + $0x420] sm:$0x7f] %vm827_vm0, %v687_v15  ;;  %v691_v27 = vadd.f32 %v419_v25, %v147_v23  ;;  %v149_v29 = vld [vmem:[%s3839_s0 + $0x450] sm:$0x7f]  ;;  %v692_v30 = vadd.f32 %v420_v28, %v148_v26  ;;  %v150_v32 = vld [vmem:[%s3839_s0 + $0x458] sm:$0x7f] }
  0x8a   :  { %961 = vst.msk [vmem:[%s3841_s2 + $0x428] sm:$0x7f] %vm827_vm0, %v688_v18  ;;  %v421_v31 = vld [vmem:[%s3840_s1 + $0x450] sm:$0x7f]  ;;  %v422_v34 = vld [vmem:[%s3840_s1 + $0x458] sm:$0x7f] }
  0x8b   :  { %962 = vst.msk [vmem:[%s3841_s2 + $0x430] sm:$0x7f] %vm827_vm0, %v689_v21  ;;  %v693_v33 = vadd.f32 %v421_v31, %v149_v29  ;;  %v151_v35 = vld [vmem:[%s3839_s0 + $0x460] sm:$0x7f]  ;;  %v694_v36 = vadd.f32 %v422_v34, %v150_v32  ;;  %v152_v38 = vld [vmem:[%s3839_s0 + $0x468] sm:$0x7f] }
  0x8c   :  { %963 = vst.msk [vmem:[%s3841_s2 + $0x438] sm:$0x7f] %vm827_vm0, %v690_v24  ;;  %v423_v37 = vld [vmem:[%s3840_s1 + $0x460] sm:$0x7f]  ;;  %v424_v40 = vld [vmem:[%s3840_s1 + $0x468] sm:$0x7f] }
  0x8d   :  { %964 = vst.msk [vmem:[%s3841_s2 + $0x440] sm:$0x7f] %vm827_vm0, %v691_v27  ;;  %v695_v39 = vadd.f32 %v423_v37, %v151_v35  ;;  %v153_v41 = vld [vmem:[%s3839_s0 + $0x470] sm:$0x7f]  ;;  %v696_v42 = vadd.f32 %v424_v40, %v152_v38  ;;  %v154_v44 = vld [vmem:[%s3839_s0 + $0x478] sm:$0x7f] }
  0x8e   :  { %965 = vst.msk [vmem:[%s3841_s2 + $0x448] sm:$0x7f] %vm827_vm0, %v692_v30  ;;  %v425_v43 = vld [vmem:[%s3840_s1 + $0x470] sm:$0x7f]  ;;  %v426_v46 = vld [vmem:[%s3840_s1 + $0x478] sm:$0x7f] }
  0x8f   :  { %966 = vst.msk [vmem:[%s3841_s2 + $0x450] sm:$0x7f] %vm827_vm0, %v693_v33  ;;  %v697_v45 = vadd.f32 %v425_v43, %v153_v41  ;;  %v155_v47 = vld [vmem:[%s3839_s0 + $0x480] sm:$0x7f]  ;;  %v698_v48 = vadd.f32 %v426_v46, %v154_v44  ;;  %v156_v50 = vld [vmem:[%s3839_s0 + $0x488] sm:$0x7f] }
  0x90   :  { %967 = vst.msk [vmem:[%s3841_s2 + $0x458] sm:$0x7f] %vm827_vm0, %v694_v36  ;;  %v427_v49 = vld [vmem:[%s3840_s1 + $0x480] sm:$0x7f]  ;;  %v428_v52 = vld [vmem:[%s3840_s1 + $0x488] sm:$0x7f] }
  0x91   :  { %968 = vst.msk [vmem:[%s3841_s2 + $0x460] sm:$0x7f] %vm827_vm0, %v695_v39  ;;  %v699_v51 = vadd.f32 %v427_v49, %v155_v47  ;;  %v157_v53 = vld [vmem:[%s3839_s0 + $0x490] sm:$0x7f]  ;;  %v700_v54 = vadd.f32 %v428_v52, %v156_v50  ;;  %v158_v56 = vld [vmem:[%s3839_s0 + $0x498] sm:$0x7f] }
  0x92   :  { %969 = vst.msk [vmem:[%s3841_s2 + $0x468] sm:$0x7f] %vm827_vm0, %v696_v42  ;;  %v429_v55 = vld [vmem:[%s3840_s1 + $0x490] sm:$0x7f]  ;;  %v430_v58 = vld [vmem:[%s3840_s1 + $0x498] sm:$0x7f] }
  0x93   :  { %970 = vst.msk [vmem:[%s3841_s2 + $0x470] sm:$0x7f] %vm827_vm0, %v697_v45  ;;  %v701_v57 = vadd.f32 %v429_v55, %v157_v53  ;;  %v159_v59 = vld [vmem:[%s3839_s0 + $0x4a0] sm:$0x7f]  ;;  %v702_v60 = vadd.f32 %v430_v58, %v158_v56  ;;  %v160_v62 = vld [vmem:[%s3839_s0 + $0x4a8] sm:$0x7f] }
  0x94   :  { %971 = vst.msk [vmem:[%s3841_s2 + $0x478] sm:$0x7f] %vm827_vm0, %v698_v48  ;;  %v431_v61 = vld [vmem:[%s3840_s1 + $0x4a0] sm:$0x7f]  ;;  %v432_v0 = vld [vmem:[%s3840_s1 + $0x4a8] sm:$0x7f] }
  0x95   :  { %972 = vst.msk [vmem:[%s3841_s2 + $0x480] sm:$0x7f] %vm827_vm0, %v699_v51  ;;  %v703_v63 = vadd.f32 %v431_v61, %v159_v59  ;;  %v161_v1 = vld [vmem:[%s3839_s0 + $0x4b0] sm:$0x7f]  ;;  %v704_v2 = vadd.f32 %v432_v0, %v160_v62  ;;  %v162_v4 = vld [vmem:[%s3839_s0 + $0x4b8] sm:$0x7f] }
  0x96   :  { %973 = vst.msk [vmem:[%s3841_s2 + $0x488] sm:$0x7f] %vm827_vm0, %v700_v54  ;;  %v433_v3 = vld [vmem:[%s3840_s1 + $0x4b0] sm:$0x7f]  ;;  %v434_v6 = vld [vmem:[%s3840_s1 + $0x4b8] sm:$0x7f] }
  0x97   :  { %974 = vst.msk [vmem:[%s3841_s2 + $0x490] sm:$0x7f] %vm827_vm0, %v701_v57  ;;  %v705_v5 = vadd.f32 %v433_v3, %v161_v1  ;;  %v163_v7 = vld [vmem:[%s3839_s0 + $0x4c0] sm:$0x7f]  ;;  %v706_v8 = vadd.f32 %v434_v6, %v162_v4  ;;  %v164_v10 = vld [vmem:[%s3839_s0 + $0x4c8] sm:$0x7f] }
  0x98   :  { %975 = vst.msk [vmem:[%s3841_s2 + $0x498] sm:$0x7f] %vm827_vm0, %v702_v60  ;;  %v435_v9 = vld [vmem:[%s3840_s1 + $0x4c0] sm:$0x7f]  ;;  %v436_v12 = vld [vmem:[%s3840_s1 + $0x4c8] sm:$0x7f] }
  0x99   :  { %976 = vst.msk [vmem:[%s3841_s2 + $0x4a0] sm:$0x7f] %vm827_vm0, %v703_v63  ;;  %v707_v11 = vadd.f32 %v435_v9, %v163_v7  ;;  %v165_v13 = vld [vmem:[%s3839_s0 + $0x4d0] sm:$0x7f]  ;;  %v708_v14 = vadd.f32 %v436_v12, %v164_v10  ;;  %v166_v16 = vld [vmem:[%s3839_s0 + $0x4d8] sm:$0x7f] }
  0x9a   :  { %977 = vst.msk [vmem:[%s3841_s2 + $0x4a8] sm:$0x7f] %vm827_vm0, %v704_v2  ;;  %v437_v15 = vld [vmem:[%s3840_s1 + $0x4d0] sm:$0x7f]  ;;  %v438_v18 = vld [vmem:[%s3840_s1 + $0x4d8] sm:$0x7f] }
  0x9b   :  { %978 = vst.msk [vmem:[%s3841_s2 + $0x4b0] sm:$0x7f] %vm827_vm0, %v705_v5  ;;  %v709_v17 = vadd.f32 %v437_v15, %v165_v13  ;;  %v167_v19 = vld [vmem:[%s3839_s0 + $0x4e0] sm:$0x7f]  ;;  %v710_v20 = vadd.f32 %v438_v18, %v166_v16  ;;  %v168_v22 = vld [vmem:[%s3839_s0 + $0x4e8] sm:$0x7f] }
  0x9c   :  { %979 = vst.msk [vmem:[%s3841_s2 + $0x4b8] sm:$0x7f] %vm827_vm0, %v706_v8  ;;  %v439_v21 = vld [vmem:[%s3840_s1 + $0x4e0] sm:$0x7f]  ;;  %v440_v24 = vld [vmem:[%s3840_s1 + $0x4e8] sm:$0x7f] }
  0x9d   :  { %980 = vst.msk [vmem:[%s3841_s2 + $0x4c0] sm:$0x7f] %vm827_vm0, %v707_v11  ;;  %v711_v23 = vadd.f32 %v439_v21, %v167_v19  ;;  %v169_v25 = vld [vmem:[%s3839_s0 + $0x4f0] sm:$0x7f]  ;;  %v712_v26 = vadd.f32 %v440_v24, %v168_v22  ;;  %v170_v28 = vld [vmem:[%s3839_s0 + $0x4f8] sm:$0x7f] }
  0x9e   :  { %981 = vst.msk [vmem:[%s3841_s2 + $0x4c8] sm:$0x7f] %vm827_vm0, %v708_v14  ;;  %v441_v27 = vld [vmem:[%s3840_s1 + $0x4f0] sm:$0x7f]  ;;  %v442_v30 = vld [vmem:[%s3840_s1 + $0x4f8] sm:$0x7f] }
  0x9f   :  { %982 = vst.msk [vmem:[%s3841_s2 + $0x4d0] sm:$0x7f] %vm827_vm0, %v709_v17  ;;  %v713_v29 = vadd.f32 %v441_v27, %v169_v25  ;;  %v171_v31 = vld [vmem:[%s3839_s0 + $0x500] sm:$0x7f]  ;;  %v714_v32 = vadd.f32 %v442_v30, %v170_v28  ;;  %v172_v34 = vld [vmem:[%s3839_s0 + $0x508] sm:$0x7f] }
  0xa0   :  { %983 = vst.msk [vmem:[%s3841_s2 + $0x4d8] sm:$0x7f] %vm827_vm0, %v710_v20  ;;  %v443_v33 = vld [vmem:[%s3840_s1 + $0x500] sm:$0x7f]  ;;  %v444_v36 = vld [vmem:[%s3840_s1 + $0x508] sm:$0x7f] }
  0xa1   :  { %984 = vst.msk [vmem:[%s3841_s2 + $0x4e0] sm:$0x7f] %vm827_vm0, %v711_v23  ;;  %v715_v35 = vadd.f32 %v443_v33, %v171_v31  ;;  %v173_v37 = vld [vmem:[%s3839_s0 + $0x510] sm:$0x7f]  ;;  %v716_v38 = vadd.f32 %v444_v36, %v172_v34  ;;  %v174_v40 = vld [vmem:[%s3839_s0 + $0x518] sm:$0x7f] }
  0xa2   :  { %985 = vst.msk [vmem:[%s3841_s2 + $0x4e8] sm:$0x7f] %vm827_vm0, %v712_v26  ;;  %v445_v39 = vld [vmem:[%s3840_s1 + $0x510] sm:$0x7f]  ;;  %v446_v42 = vld [vmem:[%s3840_s1 + $0x518] sm:$0x7f] }
  0xa3   :  { %986 = vst.msk [vmem:[%s3841_s2 + $0x4f0] sm:$0x7f] %vm827_vm0, %v713_v29  ;;  %v717_v41 = vadd.f32 %v445_v39, %v173_v37  ;;  %v175_v43 = vld [vmem:[%s3839_s0 + $0x520] sm:$0x7f]  ;;  %v718_v44 = vadd.f32 %v446_v42, %v174_v40  ;;  %v176_v46 = vld [vmem:[%s3839_s0 + $0x528] sm:$0x7f] }
  0xa4   :  { %987 = vst.msk [vmem:[%s3841_s2 + $0x4f8] sm:$0x7f] %vm827_vm0, %v714_v32  ;;  %v447_v45 = vld [vmem:[%s3840_s1 + $0x520] sm:$0x7f]  ;;  %v448_v48 = vld [vmem:[%s3840_s1 + $0x528] sm:$0x7f] }
  0xa5   :  { %988 = vst.msk [vmem:[%s3841_s2 + $0x500] sm:$0x7f] %vm827_vm0, %v715_v35  ;;  %v719_v47 = vadd.f32 %v447_v45, %v175_v43  ;;  %v177_v49 = vld [vmem:[%s3839_s0 + $0x530] sm:$0x7f]  ;;  %v720_v50 = vadd.f32 %v448_v48, %v176_v46  ;;  %v178_v52 = vld [vmem:[%s3839_s0 + $0x538] sm:$0x7f] }
  0xa6   :  { %989 = vst.msk [vmem:[%s3841_s2 + $0x508] sm:$0x7f] %vm827_vm0, %v716_v38  ;;  %v449_v51 = vld [vmem:[%s3840_s1 + $0x530] sm:$0x7f]  ;;  %v450_v54 = vld [vmem:[%s3840_s1 + $0x538] sm:$0x7f] }
  0xa7   :  { %990 = vst.msk [vmem:[%s3841_s2 + $0x510] sm:$0x7f] %vm827_vm0, %v717_v41  ;;  %v721_v53 = vadd.f32 %v449_v51, %v177_v49  ;;  %v179_v55 = vld [vmem:[%s3839_s0 + $0x540] sm:$0x7f]  ;;  %v722_v56 = vadd.f32 %v450_v54, %v178_v52  ;;  %v180_v58 = vld [vmem:[%s3839_s0 + $0x548] sm:$0x7f] }
  0xa8   :  { %991 = vst.msk [vmem:[%s3841_s2 + $0x518] sm:$0x7f] %vm827_vm0, %v718_v44  ;;  %v451_v57 = vld [vmem:[%s3840_s1 + $0x540] sm:$0x7f]  ;;  %v452_v60 = vld [vmem:[%s3840_s1 + $0x548] sm:$0x7f] }
  0xa9   :  { %992 = vst.msk [vmem:[%s3841_s2 + $0x520] sm:$0x7f] %vm827_vm0, %v719_v47  ;;  %v723_v59 = vadd.f32 %v451_v57, %v179_v55  ;;  %v181_v61 = vld [vmem:[%s3839_s0 + $0x550] sm:$0x7f]  ;;  %v724_v62 = vadd.f32 %v452_v60, %v180_v58  ;;  %v182_v0 = vld [vmem:[%s3839_s0 + $0x558] sm:$0x7f] }
  0xaa   :  { %993 = vst.msk [vmem:[%s3841_s2 + $0x528] sm:$0x7f] %vm827_vm0, %v720_v50  ;;  %v453_v63 = vld [vmem:[%s3840_s1 + $0x550] sm:$0x7f]  ;;  %v454_v2 = vld [vmem:[%s3840_s1 + $0x558] sm:$0x7f] }
  0xab   :  { %994 = vst.msk [vmem:[%s3841_s2 + $0x530] sm:$0x7f] %vm827_vm0, %v721_v53  ;;  %v725_v1 = vadd.f32 %v453_v63, %v181_v61  ;;  %v183_v3 = vld [vmem:[%s3839_s0 + $0x560] sm:$0x7f]  ;;  %v726_v4 = vadd.f32 %v454_v2, %v182_v0  ;;  %v184_v6 = vld [vmem:[%s3839_s0 + $0x568] sm:$0x7f] }
  0xac   :  { %995 = vst.msk [vmem:[%s3841_s2 + $0x538] sm:$0x7f] %vm827_vm0, %v722_v56  ;;  %v455_v5 = vld [vmem:[%s3840_s1 + $0x560] sm:$0x7f]  ;;  %v456_v8 = vld [vmem:[%s3840_s1 + $0x568] sm:$0x7f] }
  0xad   :  { %996 = vst.msk [vmem:[%s3841_s2 + $0x540] sm:$0x7f] %vm827_vm0, %v723_v59  ;;  %v727_v7 = vadd.f32 %v455_v5, %v183_v3  ;;  %v185_v9 = vld [vmem:[%s3839_s0 + $0x570] sm:$0x7f]  ;;  %v728_v10 = vadd.f32 %v456_v8, %v184_v6  ;;  %v186_v12 = vld [vmem:[%s3839_s0 + $0x578] sm:$0x7f] }
  0xae   :  { %997 = vst.msk [vmem:[%s3841_s2 + $0x548] sm:$0x7f] %vm827_vm0, %v724_v62  ;;  %v457_v11 = vld [vmem:[%s3840_s1 + $0x570] sm:$0x7f]  ;;  %v458_v14 = vld [vmem:[%s3840_s1 + $0x578] sm:$0x7f] }
  0xaf   :  { %998 = vst.msk [vmem:[%s3841_s2 + $0x550] sm:$0x7f] %vm827_vm0, %v725_v1  ;;  %v729_v13 = vadd.f32 %v457_v11, %v185_v9  ;;  %v187_v15 = vld [vmem:[%s3839_s0 + $0x580] sm:$0x7f]  ;;  %v730_v16 = vadd.f32 %v458_v14, %v186_v12  ;;  %v188_v18 = vld [vmem:[%s3839_s0 + $0x588] sm:$0x7f] }
  0xb0   :  { %999 = vst.msk [vmem:[%s3841_s2 + $0x558] sm:$0x7f] %vm827_vm0, %v726_v4  ;;  %v459_v17 = vld [vmem:[%s3840_s1 + $0x580] sm:$0x7f]  ;;  %v460_v20 = vld [vmem:[%s3840_s1 + $0x588] sm:$0x7f] }
  0xb1   :  { %1000 = vst.msk [vmem:[%s3841_s2 + $0x560] sm:$0x7f] %vm827_vm0, %v727_v7  ;;  %v731_v19 = vadd.f32 %v459_v17, %v187_v15  ;;  %v189_v21 = vld [vmem:[%s3839_s0 + $0x590] sm:$0x7f]  ;;  %v732_v22 = vadd.f32 %v460_v20, %v188_v18  ;;  %v190_v24 = vld [vmem:[%s3839_s0 + $0x598] sm:$0x7f] }
  0xb2   :  { %1001 = vst.msk [vmem:[%s3841_s2 + $0x568] sm:$0x7f] %vm827_vm0, %v728_v10  ;;  %v461_v23 = vld [vmem:[%s3840_s1 + $0x590] sm:$0x7f]  ;;  %v462_v26 = vld [vmem:[%s3840_s1 + $0x598] sm:$0x7f] }
  0xb3   :  { %1002 = vst.msk [vmem:[%s3841_s2 + $0x570] sm:$0x7f] %vm827_vm0, %v729_v13  ;;  %v733_v25 = vadd.f32 %v461_v23, %v189_v21  ;;  %v191_v27 = vld [vmem:[%s3839_s0 + $0x5a0] sm:$0x7f]  ;;  %v734_v28 = vadd.f32 %v462_v26, %v190_v24  ;;  %v192_v30 = vld [vmem:[%s3839_s0 + $0x5a8] sm:$0x7f] }
  0xb4   :  { %1003 = vst.msk [vmem:[%s3841_s2 + $0x578] sm:$0x7f] %vm827_vm0, %v730_v16  ;;  %v463_v29 = vld [vmem:[%s3840_s1 + $0x5a0] sm:$0x7f]  ;;  %v464_v32 = vld [vmem:[%s3840_s1 + $0x5a8] sm:$0x7f] }
  0xb5   :  { %1004 = vst.msk [vmem:[%s3841_s2 + $0x580] sm:$0x7f] %vm827_vm0, %v731_v19  ;;  %v735_v31 = vadd.f32 %v463_v29, %v191_v27  ;;  %v193_v33 = vld [vmem:[%s3839_s0 + $0x5b0] sm:$0x7f]  ;;  %v736_v34 = vadd.f32 %v464_v32, %v192_v30  ;;  %v194_v36 = vld [vmem:[%s3839_s0 + $0x5b8] sm:$0x7f] }
  0xb6   :  { %1005 = vst.msk [vmem:[%s3841_s2 + $0x588] sm:$0x7f] %vm827_vm0, %v732_v22  ;;  %v465_v35 = vld [vmem:[%s3840_s1 + $0x5b0] sm:$0x7f]  ;;  %v466_v38 = vld [vmem:[%s3840_s1 + $0x5b8] sm:$0x7f] }
  0xb7   :  { %1006 = vst.msk [vmem:[%s3841_s2 + $0x590] sm:$0x7f] %vm827_vm0, %v733_v25  ;;  %v737_v37 = vadd.f32 %v465_v35, %v193_v33  ;;  %v195_v39 = vld [vmem:[%s3839_s0 + $0x5c0] sm:$0x7f]  ;;  %v738_v40 = vadd.f32 %v466_v38, %v194_v36  ;;  %v196_v42 = vld [vmem:[%s3839_s0 + $0x5c8] sm:$0x7f] }
  0xb8   :  { %1007 = vst.msk [vmem:[%s3841_s2 + $0x598] sm:$0x7f] %vm827_vm0, %v734_v28  ;;  %v467_v41 = vld [vmem:[%s3840_s1 + $0x5c0] sm:$0x7f]  ;;  %v468_v44 = vld [vmem:[%s3840_s1 + $0x5c8] sm:$0x7f] }
  0xb9   :  { %1008 = vst.msk [vmem:[%s3841_s2 + $0x5a0] sm:$0x7f] %vm827_vm0, %v735_v31  ;;  %v739_v43 = vadd.f32 %v467_v41, %v195_v39  ;;  %v197_v45 = vld [vmem:[%s3839_s0 + $0x5d0] sm:$0x7f]  ;;  %v740_v46 = vadd.f32 %v468_v44, %v196_v42  ;;  %v198_v48 = vld [vmem:[%s3839_s0 + $0x5d8] sm:$0x7f] }
  0xba   :  { %1009 = vst.msk [vmem:[%s3841_s2 + $0x5a8] sm:$0x7f] %vm827_vm0, %v736_v34  ;;  %v469_v47 = vld [vmem:[%s3840_s1 + $0x5d0] sm:$0x7f]  ;;  %v470_v50 = vld [vmem:[%s3840_s1 + $0x5d8] sm:$0x7f] }
  0xbb   :  { %1010 = vst.msk [vmem:[%s3841_s2 + $0x5b0] sm:$0x7f] %vm827_vm0, %v737_v37  ;;  %v741_v49 = vadd.f32 %v469_v47, %v197_v45  ;;  %v199_v51 = vld [vmem:[%s3839_s0 + $0x5e0] sm:$0x7f]  ;;  %v742_v52 = vadd.f32 %v470_v50, %v198_v48  ;;  %v200_v54 = vld [vmem:[%s3839_s0 + $0x5e8] sm:$0x7f] }
  0xbc   :  { %1011 = vst.msk [vmem:[%s3841_s2 + $0x5b8] sm:$0x7f] %vm827_vm0, %v738_v40  ;;  %v471_v53 = vld [vmem:[%s3840_s1 + $0x5e0] sm:$0x7f]  ;;  %v472_v56 = vld [vmem:[%s3840_s1 + $0x5e8] sm:$0x7f] }
  0xbd   :  { %1012 = vst.msk [vmem:[%s3841_s2 + $0x5c0] sm:$0x7f] %vm827_vm0, %v739_v43  ;;  %v743_v55 = vadd.f32 %v471_v53, %v199_v51  ;;  %v201_v57 = vld [vmem:[%s3839_s0 + $0x5f0] sm:$0x7f]  ;;  %v744_v58 = vadd.f32 %v472_v56, %v200_v54  ;;  %v202_v60 = vld [vmem:[%s3839_s0 + $0x5f8] sm:$0x7f] }
  0xbe   :  { %1013 = vst.msk [vmem:[%s3841_s2 + $0x5c8] sm:$0x7f] %vm827_vm0, %v740_v46  ;;  %v473_v59 = vld [vmem:[%s3840_s1 + $0x5f0] sm:$0x7f]  ;;  %v474_v62 = vld [vmem:[%s3840_s1 + $0x5f8] sm:$0x7f] }
  0xbf   :  { %1014 = vst.msk [vmem:[%s3841_s2 + $0x5d0] sm:$0x7f] %vm827_vm0, %v741_v49  ;;  %v745_v61 = vadd.f32 %v473_v59, %v201_v57  ;;  %v203_v63 = vld [vmem:[%s3839_s0 + $0x600] sm:$0x7f]  ;;  %v746_v0 = vadd.f32 %v474_v62, %v202_v60  ;;  %v204_v2 = vld [vmem:[%s3839_s0 + $0x608] sm:$0x7f] }
  0xc0   :  { %1015 = vst.msk [vmem:[%s3841_s2 + $0x5d8] sm:$0x7f] %vm827_vm0, %v742_v52  ;;  %v475_v1 = vld [vmem:[%s3840_s1 + $0x600] sm:$0x7f]  ;;  %v476_v4 = vld [vmem:[%s3840_s1 + $0x608] sm:$0x7f] }
  0xc1   :  { %1016 = vst.msk [vmem:[%s3841_s2 + $0x5e0] sm:$0x7f] %vm827_vm0, %v743_v55  ;;  %v747_v3 = vadd.f32 %v475_v1, %v203_v63  ;;  %v205_v5 = vld [vmem:[%s3839_s0 + $0x610] sm:$0x7f]  ;;  %v748_v6 = vadd.f32 %v476_v4, %v204_v2  ;;  %v206_v8 = vld [vmem:[%s3839_s0 + $0x618] sm:$0x7f] }
  0xc2   :  { %1017 = vst.msk [vmem:[%s3841_s2 + $0x5e8] sm:$0x7f] %vm827_vm0, %v744_v58  ;;  %v477_v7 = vld [vmem:[%s3840_s1 + $0x610] sm:$0x7f]  ;;  %v478_v10 = vld [vmem:[%s3840_s1 + $0x618] sm:$0x7f] }
  0xc3   :  { %1018 = vst.msk [vmem:[%s3841_s2 + $0x5f0] sm:$0x7f] %vm827_vm0, %v745_v61  ;;  %v749_v9 = vadd.f32 %v477_v7, %v205_v5  ;;  %v207_v11 = vld [vmem:[%s3839_s0 + $0x620] sm:$0x7f]  ;;  %v750_v12 = vadd.f32 %v478_v10, %v206_v8  ;;  %v208_v14 = vld [vmem:[%s3839_s0 + $0x628] sm:$0x7f] }
  0xc4   :  { %1019 = vst.msk [vmem:[%s3841_s2 + $0x5f8] sm:$0x7f] %vm827_vm0, %v746_v0  ;;  %v479_v13 = vld [vmem:[%s3840_s1 + $0x620] sm:$0x7f]  ;;  %v480_v16 = vld [vmem:[%s3840_s1 + $0x628] sm:$0x7f] }
  0xc5   :  { %1020 = vst.msk [vmem:[%s3841_s2 + $0x600] sm:$0x7f] %vm827_vm0, %v747_v3  ;;  %v751_v15 = vadd.f32 %v479_v13, %v207_v11  ;;  %v209_v17 = vld [vmem:[%s3839_s0 + $0x630] sm:$0x7f]  ;;  %v752_v18 = vadd.f32 %v480_v16, %v208_v14  ;;  %v210_v20 = vld [vmem:[%s3839_s0 + $0x638] sm:$0x7f] }
  0xc6   :  { %1021 = vst.msk [vmem:[%s3841_s2 + $0x608] sm:$0x7f] %vm827_vm0, %v748_v6  ;;  %v481_v19 = vld [vmem:[%s3840_s1 + $0x630] sm:$0x7f]  ;;  %v482_v22 = vld [vmem:[%s3840_s1 + $0x638] sm:$0x7f] }
  0xc7   :  { %1022 = vst.msk [vmem:[%s3841_s2 + $0x610] sm:$0x7f] %vm827_vm0, %v749_v9  ;;  %v753_v21 = vadd.f32 %v481_v19, %v209_v17  ;;  %v211_v23 = vld [vmem:[%s3839_s0 + $0x640] sm:$0x7f]  ;;  %v754_v24 = vadd.f32 %v482_v22, %v210_v20  ;;  %v212_v26 = vld [vmem:[%s3839_s0 + $0x648] sm:$0x7f] }
  0xc8   :  { %1023 = vst.msk [vmem:[%s3841_s2 + $0x618] sm:$0x7f] %vm827_vm0, %v750_v12  ;;  %v483_v25 = vld [vmem:[%s3840_s1 + $0x640] sm:$0x7f]  ;;  %v484_v28 = vld [vmem:[%s3840_s1 + $0x648] sm:$0x7f] }
  0xc9   :  { %1024 = vst.msk [vmem:[%s3841_s2 + $0x620] sm:$0x7f] %vm827_vm0, %v751_v15  ;;  %v755_v27 = vadd.f32 %v483_v25, %v211_v23  ;;  %v213_v29 = vld [vmem:[%s3839_s0 + $0x650] sm:$0x7f]  ;;  %v756_v30 = vadd.f32 %v484_v28, %v212_v26  ;;  %v214_v32 = vld [vmem:[%s3839_s0 + $0x658] sm:$0x7f] }
  0xca   :  { %1025 = vst.msk [vmem:[%s3841_s2 + $0x628] sm:$0x7f] %vm827_vm0, %v752_v18  ;;  %v485_v31 = vld [vmem:[%s3840_s1 + $0x650] sm:$0x7f]  ;;  %v486_v34 = vld [vmem:[%s3840_s1 + $0x658] sm:$0x7f] }
  0xcb   :  { %1026 = vst.msk [vmem:[%s3841_s2 + $0x630] sm:$0x7f] %vm827_vm0, %v753_v21  ;;  %v757_v33 = vadd.f32 %v485_v31, %v213_v29  ;;  %v215_v35 = vld [vmem:[%s3839_s0 + $0x660] sm:$0x7f]  ;;  %v758_v36 = vadd.f32 %v486_v34, %v214_v32  ;;  %v216_v38 = vld [vmem:[%s3839_s0 + $0x668] sm:$0x7f] }
  0xcc   :  { %1027 = vst.msk [vmem:[%s3841_s2 + $0x638] sm:$0x7f] %vm827_vm0, %v754_v24  ;;  %v487_v37 = vld [vmem:[%s3840_s1 + $0x660] sm:$0x7f]  ;;  %v488_v40 = vld [vmem:[%s3840_s1 + $0x668] sm:$0x7f] }
  0xcd   :  { %1028 = vst.msk [vmem:[%s3841_s2 + $0x640] sm:$0x7f] %vm827_vm0, %v755_v27  ;;  %v759_v39 = vadd.f32 %v487_v37, %v215_v35  ;;  %v217_v41 = vld [vmem:[%s3839_s0 + $0x670] sm:$0x7f]  ;;  %v760_v42 = vadd.f32 %v488_v40, %v216_v38  ;;  %v218_v44 = vld [vmem:[%s3839_s0 + $0x678] sm:$0x7f] }
  0xce   :  { %1029 = vst.msk [vmem:[%s3841_s2 + $0x648] sm:$0x7f] %vm827_vm0, %v756_v30  ;;  %v489_v43 = vld [vmem:[%s3840_s1 + $0x670] sm:$0x7f]  ;;  %v490_v46 = vld [vmem:[%s3840_s1 + $0x678] sm:$0x7f] }
  0xcf   :  { %1030 = vst.msk [vmem:[%s3841_s2 + $0x650] sm:$0x7f] %vm827_vm0, %v757_v33  ;;  %v761_v45 = vadd.f32 %v489_v43, %v217_v41  ;;  %v219_v47 = vld [vmem:[%s3839_s0 + $0x680] sm:$0x7f]  ;;  %v762_v48 = vadd.f32 %v490_v46, %v218_v44  ;;  %v220_v50 = vld [vmem:[%s3839_s0 + $0x688] sm:$0x7f] }
  0xd0   :  { %1031 = vst.msk [vmem:[%s3841_s2 + $0x658] sm:$0x7f] %vm827_vm0, %v758_v36  ;;  %v491_v49 = vld [vmem:[%s3840_s1 + $0x680] sm:$0x7f]  ;;  %v492_v52 = vld [vmem:[%s3840_s1 + $0x688] sm:$0x7f] }
  0xd1   :  { %1032 = vst.msk [vmem:[%s3841_s2 + $0x660] sm:$0x7f] %vm827_vm0, %v759_v39  ;;  %v763_v51 = vadd.f32 %v491_v49, %v219_v47  ;;  %v221_v53 = vld [vmem:[%s3839_s0 + $0x690] sm:$0x7f]  ;;  %v764_v54 = vadd.f32 %v492_v52, %v220_v50  ;;  %v222_v56 = vld [vmem:[%s3839_s0 + $0x698] sm:$0x7f] }
  0xd2   :  { %1033 = vst.msk [vmem:[%s3841_s2 + $0x668] sm:$0x7f] %vm827_vm0, %v760_v42  ;;  %v493_v55 = vld [vmem:[%s3840_s1 + $0x690] sm:$0x7f]  ;;  %v494_v58 = vld [vmem:[%s3840_s1 + $0x698] sm:$0x7f] }
  0xd3   :  { %1034 = vst.msk [vmem:[%s3841_s2 + $0x670] sm:$0x7f] %vm827_vm0, %v761_v45  ;;  %v765_v57 = vadd.f32 %v493_v55, %v221_v53  ;;  %v223_v59 = vld [vmem:[%s3839_s0 + $0x6a0] sm:$0x7f]  ;;  %v766_v60 = vadd.f32 %v494_v58, %v222_v56  ;;  %v224_v62 = vld [vmem:[%s3839_s0 + $0x6a8] sm:$0x7f] }
  0xd4   :  { %1035 = vst.msk [vmem:[%s3841_s2 + $0x678] sm:$0x7f] %vm827_vm0, %v762_v48  ;;  %v495_v61 = vld [vmem:[%s3840_s1 + $0x6a0] sm:$0x7f]  ;;  %v496_v0 = vld [vmem:[%s3840_s1 + $0x6a8] sm:$0x7f] }
  0xd5   :  { %1036 = vst.msk [vmem:[%s3841_s2 + $0x680] sm:$0x7f] %vm827_vm0, %v763_v51  ;;  %v767_v63 = vadd.f32 %v495_v61, %v223_v59  ;;  %v225_v1 = vld [vmem:[%s3839_s0 + $0x6b0] sm:$0x7f]  ;;  %v768_v2 = vadd.f32 %v496_v0, %v224_v62  ;;  %v226_v4 = vld [vmem:[%s3839_s0 + $0x6b8] sm:$0x7f] }
  0xd6   :  { %1037 = vst.msk [vmem:[%s3841_s2 + $0x688] sm:$0x7f] %vm827_vm0, %v764_v54  ;;  %v497_v3 = vld [vmem:[%s3840_s1 + $0x6b0] sm:$0x7f]  ;;  %v498_v6 = vld [vmem:[%s3840_s1 + $0x6b8] sm:$0x7f] }
  0xd7   :  { %1038 = vst.msk [vmem:[%s3841_s2 + $0x690] sm:$0x7f] %vm827_vm0, %v765_v57  ;;  %v769_v5 = vadd.f32 %v497_v3, %v225_v1  ;;  %v227_v7 = vld [vmem:[%s3839_s0 + $0x6c0] sm:$0x7f]  ;;  %v770_v8 = vadd.f32 %v498_v6, %v226_v4  ;;  %v228_v10 = vld [vmem:[%s3839_s0 + $0x6c8] sm:$0x7f] }
  0xd8   :  { %1039 = vst.msk [vmem:[%s3841_s2 + $0x698] sm:$0x7f] %vm827_vm0, %v766_v60  ;;  %v499_v9 = vld [vmem:[%s3840_s1 + $0x6c0] sm:$0x7f]  ;;  %v500_v12 = vld [vmem:[%s3840_s1 + $0x6c8] sm:$0x7f] }
  0xd9   :  { %1040 = vst.msk [vmem:[%s3841_s2 + $0x6a0] sm:$0x7f] %vm827_vm0, %v767_v63  ;;  %v771_v11 = vadd.f32 %v499_v9, %v227_v7  ;;  %v229_v13 = vld [vmem:[%s3839_s0 + $0x6d0] sm:$0x7f]  ;;  %v772_v14 = vadd.f32 %v500_v12, %v228_v10  ;;  %v230_v16 = vld [vmem:[%s3839_s0 + $0x6d8] sm:$0x7f] }
  0xda   :  { %1041 = vst.msk [vmem:[%s3841_s2 + $0x6a8] sm:$0x7f] %vm827_vm0, %v768_v2  ;;  %v501_v15 = vld [vmem:[%s3840_s1 + $0x6d0] sm:$0x7f]  ;;  %v502_v18 = vld [vmem:[%s3840_s1 + $0x6d8] sm:$0x7f] }
  0xdb   :  { %1042 = vst.msk [vmem:[%s3841_s2 + $0x6b0] sm:$0x7f] %vm827_vm0, %v769_v5  ;;  %v773_v17 = vadd.f32 %v501_v15, %v229_v13  ;;  %v231_v19 = vld [vmem:[%s3839_s0 + $0x6e0] sm:$0x7f]  ;;  %v774_v20 = vadd.f32 %v502_v18, %v230_v16  ;;  %v232_v22 = vld [vmem:[%s3839_s0 + $0x6e8] sm:$0x7f] }
  0xdc   :  { %1043 = vst.msk [vmem:[%s3841_s2 + $0x6b8] sm:$0x7f] %vm827_vm0, %v770_v8  ;;  %v503_v21 = vld [vmem:[%s3840_s1 + $0x6e0] sm:$0x7f]  ;;  %v504_v24 = vld [vmem:[%s3840_s1 + $0x6e8] sm:$0x7f] }
  0xdd   :  { %1044 = vst.msk [vmem:[%s3841_s2 + $0x6c0] sm:$0x7f] %vm827_vm0, %v771_v11  ;;  %v775_v23 = vadd.f32 %v503_v21, %v231_v19  ;;  %v233_v25 = vld [vmem:[%s3839_s0 + $0x6f0] sm:$0x7f]  ;;  %v776_v26 = vadd.f32 %v504_v24, %v232_v22  ;;  %v234_v28 = vld [vmem:[%s3839_s0 + $0x6f8] sm:$0x7f] }
  0xde   :  { %1045 = vst.msk [vmem:[%s3841_s2 + $0x6c8] sm:$0x7f] %vm827_vm0, %v772_v14  ;;  %v505_v27 = vld [vmem:[%s3840_s1 + $0x6f0] sm:$0x7f]  ;;  %v506_v30 = vld [vmem:[%s3840_s1 + $0x6f8] sm:$0x7f] }
  0xdf   :  { %1046 = vst.msk [vmem:[%s3841_s2 + $0x6d0] sm:$0x7f] %vm827_vm0, %v773_v17  ;;  %v777_v29 = vadd.f32 %v505_v27, %v233_v25  ;;  %v235_v31 = vld [vmem:[%s3839_s0 + $0x700] sm:$0x7f]  ;;  %v778_v32 = vadd.f32 %v506_v30, %v234_v28  ;;  %v236_v34 = vld [vmem:[%s3839_s0 + $0x708] sm:$0x7f] }
  0xe0   :  { %1047 = vst.msk [vmem:[%s3841_s2 + $0x6d8] sm:$0x7f] %vm827_vm0, %v774_v20  ;;  %v507_v33 = vld [vmem:[%s3840_s1 + $0x700] sm:$0x7f]  ;;  %v508_v36 = vld [vmem:[%s3840_s1 + $0x708] sm:$0x7f] }
  0xe1   :  { %1048 = vst.msk [vmem:[%s3841_s2 + $0x6e0] sm:$0x7f] %vm827_vm0, %v775_v23  ;;  %v779_v35 = vadd.f32 %v507_v33, %v235_v31  ;;  %v237_v37 = vld [vmem:[%s3839_s0 + $0x710] sm:$0x7f]  ;;  %v780_v38 = vadd.f32 %v508_v36, %v236_v34  ;;  %v238_v40 = vld [vmem:[%s3839_s0 + $0x718] sm:$0x7f] }
  0xe2   :  { %1049 = vst.msk [vmem:[%s3841_s2 + $0x6e8] sm:$0x7f] %vm827_vm0, %v776_v26  ;;  %v509_v39 = vld [vmem:[%s3840_s1 + $0x710] sm:$0x7f]  ;;  %v510_v42 = vld [vmem:[%s3840_s1 + $0x718] sm:$0x7f] }
  0xe3   :  { %1050 = vst.msk [vmem:[%s3841_s2 + $0x6f0] sm:$0x7f] %vm827_vm0, %v777_v29  ;;  %v781_v41 = vadd.f32 %v509_v39, %v237_v37  ;;  %v239_v43 = vld [vmem:[%s3839_s0 + $0x720] sm:$0x7f]  ;;  %v782_v44 = vadd.f32 %v510_v42, %v238_v40  ;;  %v240_v46 = vld [vmem:[%s3839_s0 + $0x728] sm:$0x7f] }
  0xe4   :  { %1051 = vst.msk [vmem:[%s3841_s2 + $0x6f8] sm:$0x7f] %vm827_vm0, %v778_v32  ;;  %v511_v45 = vld [vmem:[%s3840_s1 + $0x720] sm:$0x7f]  ;;  %v512_v48 = vld [vmem:[%s3840_s1 + $0x728] sm:$0x7f] }
  0xe5   :  { %1052 = vst.msk [vmem:[%s3841_s2 + $0x700] sm:$0x7f] %vm827_vm0, %v779_v35  ;;  %v783_v47 = vadd.f32 %v511_v45, %v239_v43  ;;  %v241_v49 = vld [vmem:[%s3839_s0 + $0x730] sm:$0x7f]  ;;  %v784_v50 = vadd.f32 %v512_v48, %v240_v46  ;;  %v242_v52 = vld [vmem:[%s3839_s0 + $0x738] sm:$0x7f] }
  0xe6   :  { %1053 = vst.msk [vmem:[%s3841_s2 + $0x708] sm:$0x7f] %vm827_vm0, %v780_v38  ;;  %v513_v51 = vld [vmem:[%s3840_s1 + $0x730] sm:$0x7f]  ;;  %v514_v54 = vld [vmem:[%s3840_s1 + $0x738] sm:$0x7f] }
  0xe7   :  { %1054 = vst.msk [vmem:[%s3841_s2 + $0x710] sm:$0x7f] %vm827_vm0, %v781_v41  ;;  %v785_v53 = vadd.f32 %v513_v51, %v241_v49  ;;  %v243_v55 = vld [vmem:[%s3839_s0 + $0x740] sm:$0x7f]  ;;  %v786_v56 = vadd.f32 %v514_v54, %v242_v52  ;;  %v244_v58 = vld [vmem:[%s3839_s0 + $0x748] sm:$0x7f] }
  0xe8   :  { %1055 = vst.msk [vmem:[%s3841_s2 + $0x718] sm:$0x7f] %vm827_vm0, %v782_v44  ;;  %v515_v57 = vld [vmem:[%s3840_s1 + $0x740] sm:$0x7f]  ;;  %v516_v60 = vld [vmem:[%s3840_s1 + $0x748] sm:$0x7f] }
  0xe9   :  { %1056 = vst.msk [vmem:[%s3841_s2 + $0x720] sm:$0x7f] %vm827_vm0, %v783_v47  ;;  %v787_v59 = vadd.f32 %v515_v57, %v243_v55  ;;  %v245_v61 = vld [vmem:[%s3839_s0 + $0x750] sm:$0x7f]  ;;  %v788_v62 = vadd.f32 %v516_v60, %v244_v58  ;;  %v246_v0 = vld [vmem:[%s3839_s0 + $0x758] sm:$0x7f] }
  0xea   :  { %1057 = vst.msk [vmem:[%s3841_s2 + $0x728] sm:$0x7f] %vm827_vm0, %v784_v50  ;;  %v517_v63 = vld [vmem:[%s3840_s1 + $0x750] sm:$0x7f]  ;;  %v518_v2 = vld [vmem:[%s3840_s1 + $0x758] sm:$0x7f] }
  0xeb   :  { %1058 = vst.msk [vmem:[%s3841_s2 + $0x730] sm:$0x7f] %vm827_vm0, %v785_v53  ;;  %v789_v1 = vadd.f32 %v517_v63, %v245_v61  ;;  %v247_v3 = vld [vmem:[%s3839_s0 + $0x760] sm:$0x7f]  ;;  %v790_v4 = vadd.f32 %v518_v2, %v246_v0  ;;  %v248_v6 = vld [vmem:[%s3839_s0 + $0x768] sm:$0x7f] }
  0xec   :  { %1059 = vst.msk [vmem:[%s3841_s2 + $0x738] sm:$0x7f] %vm827_vm0, %v786_v56  ;;  %v519_v5 = vld [vmem:[%s3840_s1 + $0x760] sm:$0x7f]  ;;  %v520_v8 = vld [vmem:[%s3840_s1 + $0x768] sm:$0x7f] }
  0xed   :  { %1060 = vst.msk [vmem:[%s3841_s2 + $0x740] sm:$0x7f] %vm827_vm0, %v787_v59  ;;  %v791_v7 = vadd.f32 %v519_v5, %v247_v3  ;;  %v249_v9 = vld [vmem:[%s3839_s0 + $0x770] sm:$0x7f]  ;;  %v792_v10 = vadd.f32 %v520_v8, %v248_v6  ;;  %v250_v12 = vld [vmem:[%s3839_s0 + $0x778] sm:$0x7f] }
  0xee   :  { %1061 = vst.msk [vmem:[%s3841_s2 + $0x748] sm:$0x7f] %vm827_vm0, %v788_v62  ;;  %v521_v11 = vld [vmem:[%s3840_s1 + $0x770] sm:$0x7f]  ;;  %v522_v14 = vld [vmem:[%s3840_s1 + $0x778] sm:$0x7f] }
  0xef   :  { %1062 = vst.msk [vmem:[%s3841_s2 + $0x750] sm:$0x7f] %vm827_vm0, %v789_v1  ;;  %v793_v13 = vadd.f32 %v521_v11, %v249_v9  ;;  %v251_v15 = vld [vmem:[%s3839_s0 + $0x780] sm:$0x7f]  ;;  %v794_v16 = vadd.f32 %v522_v14, %v250_v12  ;;  %v252_v18 = vld [vmem:[%s3839_s0 + $0x788] sm:$0x7f] }
  0xf0   :  { %1063 = vst.msk [vmem:[%s3841_s2 + $0x758] sm:$0x7f] %vm827_vm0, %v790_v4  ;;  %v523_v17 = vld [vmem:[%s3840_s1 + $0x780] sm:$0x7f]  ;;  %v524_v20 = vld [vmem:[%s3840_s1 + $0x788] sm:$0x7f] }
  0xf1   :  { %1064 = vst.msk [vmem:[%s3841_s2 + $0x760] sm:$0x7f] %vm827_vm0, %v791_v7  ;;  %v795_v19 = vadd.f32 %v523_v17, %v251_v15  ;;  %v253_v21 = vld [vmem:[%s3839_s0 + $0x790] sm:$0x7f]  ;;  %v796_v22 = vadd.f32 %v524_v20, %v252_v18  ;;  %v254_v24 = vld [vmem:[%s3839_s0 + $0x798] sm:$0x7f] }
  0xf2   :  { %1065 = vst.msk [vmem:[%s3841_s2 + $0x768] sm:$0x7f] %vm827_vm0, %v792_v10  ;;  %v525_v23 = vld [vmem:[%s3840_s1 + $0x790] sm:$0x7f]  ;;  %v526_v26 = vld [vmem:[%s3840_s1 + $0x798] sm:$0x7f] }
  0xf3   :  { %1066 = vst.msk [vmem:[%s3841_s2 + $0x770] sm:$0x7f] %vm827_vm0, %v793_v13  ;;  %v797_v25 = vadd.f32 %v525_v23, %v253_v21  ;;  %v255_v27 = vld [vmem:[%s3839_s0 + $0x7a0] sm:$0x7f]  ;;  %v798_v28 = vadd.f32 %v526_v26, %v254_v24  ;;  %v256_v30 = vld [vmem:[%s3839_s0 + $0x7a8] sm:$0x7f] }
  0xf4   :  { %1067 = vst.msk [vmem:[%s3841_s2 + $0x778] sm:$0x7f] %vm827_vm0, %v794_v16  ;;  %v527_v29 = vld [vmem:[%s3840_s1 + $0x7a0] sm:$0x7f]  ;;  %v528_v32 = vld [vmem:[%s3840_s1 + $0x7a8] sm:$0x7f] }
  0xf5   :  { %1068 = vst.msk [vmem:[%s3841_s2 + $0x780] sm:$0x7f] %vm827_vm0, %v795_v19  ;;  %v799_v31 = vadd.f32 %v527_v29, %v255_v27  ;;  %v257_v33 = vld [vmem:[%s3839_s0 + $0x7b0] sm:$0x7f]  ;;  %v800_v34 = vadd.f32 %v528_v32, %v256_v30  ;;  %v258_v36 = vld [vmem:[%s3839_s0 + $0x7b8] sm:$0x7f] }
  0xf6   :  { %1069 = vst.msk [vmem:[%s3841_s2 + $0x788] sm:$0x7f] %vm827_vm0, %v796_v22  ;;  %v529_v35 = vld [vmem:[%s3840_s1 + $0x7b0] sm:$0x7f]  ;;  %v530_v38 = vld [vmem:[%s3840_s1 + $0x7b8] sm:$0x7f] }
  0xf7   :  { %1070 = vst.msk [vmem:[%s3841_s2 + $0x790] sm:$0x7f] %vm827_vm0, %v797_v25  ;;  %v801_v37 = vadd.f32 %v529_v35, %v257_v33  ;;  %v259_v39 = vld [vmem:[%s3839_s0 + $0x7c0] sm:$0x7f]  ;;  %v802_v40 = vadd.f32 %v530_v38, %v258_v36  ;;  %v260_v42 = vld [vmem:[%s3839_s0 + $0x7c8] sm:$0x7f] }
  0xf8   :  { %1071 = vst.msk [vmem:[%s3841_s2 + $0x798] sm:$0x7f] %vm827_vm0, %v798_v28  ;;  %v531_v41 = vld [vmem:[%s3840_s1 + $0x7c0] sm:$0x7f]  ;;  %v532_v44 = vld [vmem:[%s3840_s1 + $0x7c8] sm:$0x7f] }
  0xf9   :  { %1072 = vst.msk [vmem:[%s3841_s2 + $0x7a0] sm:$0x7f] %vm827_vm0, %v799_v31  ;;  %v803_v43 = vadd.f32 %v531_v41, %v259_v39  ;;  %v261_v45 = vld [vmem:[%s3839_s0 + $0x7d0] sm:$0x7f]  ;;  %v804_v46 = vadd.f32 %v532_v44, %v260_v42  ;;  %v262_v48 = vld [vmem:[%s3839_s0 + $0x7d8] sm:$0x7f] }
  0xfa   :  { %1073 = vst.msk [vmem:[%s3841_s2 + $0x7a8] sm:$0x7f] %vm827_vm0, %v800_v34  ;;  %v533_v47 = vld [vmem:[%s3840_s1 + $0x7d0] sm:$0x7f]  ;;  %v534_v50 = vld [vmem:[%s3840_s1 + $0x7d8] sm:$0x7f] }
  0xfb   :  { %1074 = vst.msk [vmem:[%s3841_s2 + $0x7b0] sm:$0x7f] %vm827_vm0, %v801_v37  ;;  %v805_v49 = vadd.f32 %v533_v47, %v261_v45  ;;  %v263_v51 = vld [vmem:[%s3839_s0 + $0x7e0] sm:$0x7f]  ;;  %v806_v52 = vadd.f32 %v534_v50, %v262_v48  ;;  %v264_v54 = vld [vmem:[%s3839_s0 + $0x7e8] sm:$0x7f] }
  0xfc   :  { %1075 = vst.msk [vmem:[%s3841_s2 + $0x7b8] sm:$0x7f] %vm827_vm0, %v802_v40  ;;  %v535_v53 = vld [vmem:[%s3840_s1 + $0x7e0] sm:$0x7f]  ;;  %v536_v56 = vld [vmem:[%s3840_s1 + $0x7e8] sm:$0x7f] }
  0xfd   :  { %1076 = vst.msk [vmem:[%s3841_s2 + $0x7c0] sm:$0x7f] %vm827_vm0, %v803_v43  ;;  %v807_v55 = vadd.f32 %v535_v53, %v263_v51  ;;  %v265_v57 = vld [vmem:[%s3839_s0 + $0x7f0] sm:$0x7f]  ;;  %v808_v58 = vadd.f32 %v536_v56, %v264_v54  ;;  %v266_v60 = vld [vmem:[%s3839_s0 + $0x7f8] sm:$0x7f] }
  0xfe   :  { %1077 = vst.msk [vmem:[%s3841_s2 + $0x7c8] sm:$0x7f] %vm827_vm0, %v804_v46  ;;  %v537_v59 = vld [vmem:[%s3840_s1 + $0x7f0] sm:$0x7f]  ;;  %v538_v62 = vld [vmem:[%s3840_s1 + $0x7f8] sm:$0x7f] }
  0xff   :  { %1078 = vst.msk [vmem:[%s3841_s2 + $0x7d0] sm:$0x7f] %vm827_vm0, %v805_v49  ;;  %v809_v61 = vadd.f32 %v537_v59, %v265_v57  ;;  %v267_v63 = vld [vmem:[%s3839_s0 + $0x800] sm:$0x7f]  ;;  %v810_v0 = vadd.f32 %v538_v62, %v266_v60  ;;  %v268_v2 = vld [vmem:[%s3839_s0 + $0x808] sm:$0x7f] }
 0x100   :  { %1079 = vst.msk [vmem:[%s3841_s2 + $0x7d8] sm:$0x7f] %vm827_vm0, %v806_v52  ;;  %v539_v1 = vld [vmem:[%s3840_s1 + $0x800] sm:$0x7f]  ;;  %v540_v4 = vld [vmem:[%s3840_s1 + $0x808] sm:$0x7f] }
 0x101   :  { %1080 = vst.msk [vmem:[%s3841_s2 + $0x7e0] sm:$0x7f] %vm827_vm0, %v807_v55  ;;  %v811_v3 = vadd.f32 %v539_v1, %v267_v63  ;;  %v269_v5 = vld [vmem:[%s3839_s0 + $0x810] sm:$0x7f]  ;;  %v812_v6 = vadd.f32 %v540_v4, %v268_v2  ;;  %v270_v8 = vld [vmem:[%s3839_s0 + $0x818] sm:$0x7f] }
 0x102   :  { %1081 = vst.msk [vmem:[%s3841_s2 + $0x7e8] sm:$0x7f] %vm827_vm0, %v808_v58  ;;  %v541_v7 = vld [vmem:[%s3840_s1 + $0x810] sm:$0x7f]  ;;  %v542_v10 = vld [vmem:[%s3840_s1 + $0x818] sm:$0x7f] }
 0x103   :  { %1082 = vst.msk [vmem:[%s3841_s2 + $0x7f0] sm:$0x7f] %vm827_vm0, %v809_v61  ;;  %v813_v9 = vadd.f32 %v541_v7, %v269_v5  ;;  %v271_v11 = vld [vmem:[%s3839_s0 + $0x820] sm:$0x7f]  ;;  %v814_v12 = vadd.f32 %v542_v10, %v270_v8  ;;  %v272_v14 = vld [vmem:[%s3839_s0 + $0x828] sm:$0x7f] }
 0x104   :  { %1083 = vst.msk [vmem:[%s3841_s2 + $0x7f8] sm:$0x7f] %vm827_vm0, %v810_v0  ;;  %v543_v13 = vld [vmem:[%s3840_s1 + $0x820] sm:$0x7f]  ;;  %v544_v16 = vld [vmem:[%s3840_s1 + $0x828] sm:$0x7f] }
 0x105   :  { %1084 = vst.msk [vmem:[%s3841_s2 + $0x800] sm:$0x7f] %vm827_vm0, %v811_v3  ;;  %v815_v15 = vadd.f32 %v543_v13, %v271_v11  ;;  %v273_v17 = vld [vmem:[%s3839_s0 + $0x830] sm:$0x7f]  ;;  %v816_v18 = vadd.f32 %v544_v16, %v272_v14  ;;  %v274_v20 = vld [vmem:[%s3839_s0 + $0x838] sm:$0x7f] }
 0x106   :  { %1085 = vst.msk [vmem:[%s3841_s2 + $0x808] sm:$0x7f] %vm827_vm0, %v812_v6  ;;  %v545_v19 = vld [vmem:[%s3840_s1 + $0x830] sm:$0x7f]  ;;  %v546_v22 = vld [vmem:[%s3840_s1 + $0x838] sm:$0x7f] }
 0x107   :  { %1086 = vst.msk [vmem:[%s3841_s2 + $0x810] sm:$0x7f] %vm827_vm0, %v813_v9  ;;  %v817_v21 = vadd.f32 %v545_v19, %v273_v17  ;;  %v275_v23 = vld [vmem:[%s3839_s0 + $0x840] sm:$0x7f]  ;;  %v818_v24 = vadd.f32 %v546_v22, %v274_v20  ;;  %v276_v26 = vld [vmem:[%s3839_s0 + $0x848] sm:$0x7f] }
 0x108   :  { %1087 = vst.msk [vmem:[%s3841_s2 + $0x818] sm:$0x7f] %vm827_vm0, %v814_v12  ;;  %v547_v25 = vld [vmem:[%s3840_s1 + $0x840] sm:$0x7f]  ;;  %v548_v28 = vld [vmem:[%s3840_s1 + $0x848] sm:$0x7f] }
 0x109   :  { %1088 = vst.msk [vmem:[%s3841_s2 + $0x820] sm:$0x7f] %vm827_vm0, %v815_v15  ;;  %v819_v27 = vadd.f32 %v547_v25, %v275_v23  ;;  %v277_v29 = vld [vmem:[%s3839_s0 + $0x850] sm:$0x7f]  ;;  %v820_v30 = vadd.f32 %v548_v28, %v276_v26  ;;  %v278_v32 = vld [vmem:[%s3839_s0 + $0x858] sm:$0x7f] }
 0x10a   :  { %1089 = vst.msk [vmem:[%s3841_s2 + $0x828] sm:$0x7f] %vm827_vm0, %v816_v18  ;;  %v549_v31 = vld [vmem:[%s3840_s1 + $0x850] sm:$0x7f]  ;;  %v550_v34 = vld [vmem:[%s3840_s1 + $0x858] sm:$0x7f] }
 0x10b   :  { %1090 = vst.msk [vmem:[%s3841_s2 + $0x830] sm:$0x7f] %vm827_vm0, %v817_v21  ;;  %v821_v33 = vadd.f32 %v549_v31, %v277_v29  ;;  %v279_v35 = vld [vmem:[%s3839_s0 + $0x860] sm:$0x7f]  ;;  %v822_v36 = vadd.f32 %v550_v34, %v278_v32  ;;  %v280_v38 = vld [vmem:[%s3839_s0 + $0x868] sm:$0x7f] }
 0x10c   :  { %1091 = vst.msk [vmem:[%s3841_s2 + $0x838] sm:$0x7f] %vm827_vm0, %v818_v24  ;;  %v551_v37 = vld [vmem:[%s3840_s1 + $0x860] sm:$0x7f]  ;;  %v552_v40 = vld [vmem:[%s3840_s1 + $0x868] sm:$0x7f] }
 0x10d   :  { %1092 = vst.msk [vmem:[%s3841_s2 + $0x840] sm:$0x7f] %vm827_vm0, %v819_v27  ;;  %v823_v39 = vadd.f32 %v551_v37, %v279_v35  ;;  %v281_v41 = vld [vmem:[%s3839_s0 + $0x870] sm:$0x7f]  ;;  %v824_v42 = vadd.f32 %v552_v40, %v280_v38  ;;  %v282_v44 = vld [vmem:[%s3839_s0 + $0x878] sm:$0x7f] }
 0x10e   :  { %1093 = vst.msk [vmem:[%s3841_s2 + $0x848] sm:$0x7f] %vm827_vm0, %v820_v30  ;;  %v553_v43 = vld [vmem:[%s3840_s1 + $0x870] sm:$0x7f]  ;;  %v554_v46 = vld [vmem:[%s3840_s1 + $0x878] sm:$0x7f] }
 0x10f   :  { %1094 = vst.msk [vmem:[%s3841_s2 + $0x850] sm:$0x7f] %vm827_vm0, %v821_v33  ;;  %v825_v45 = vadd.f32 %v553_v43, %v281_v41  ;;  %v826_v47 = vadd.f32 %v554_v46, %v282_v44 }
 0x110   :  { %1095 = vst.msk [vmem:[%s3841_s2 + $0x858] sm:$0x7f] %vm827_vm0, %v822_v36 }
 0x111   :  { %1096 = vst.msk [vmem:[%s3841_s2 + $0x860] sm:$0x7f] %vm827_vm0, %v823_v39 }
 0x112   :  { %1097 = vst.msk [vmem:[%s3841_s2 + $0x868] sm:$0x7f] %vm827_vm0, %v824_v42 }
 0x113   :  { %1098 = vst.msk [vmem:[%s3841_s2 + $0x870] sm:$0x7f] %vm827_vm0, %v825_v45 }
 0x114   :  { %1099 = vst.msk [vmem:[%s3841_s2 + $0x878] sm:$0x7f] %vm827_vm0, %v826_v47 }

</bundles_post_ra>
